<compile_context>
chip_gen: v5e
topology: v5e:2x2
jax: 0.10.0
libtpu: 0.0.40
codegen_flags: <defaults>
</compile_context>

<pallas_src>
import jax
import jax.numpy as jnp
from jax.experimental import pallas as pl
from jax.experimental.pallas import tpu as pltpu


def _round_up(x, m):
    return ((x + m - 1) // m) * m


def _pcm_kernel(x_ref, w1_ref, b1_ref, w2_ref, b2_ref, w3_ref, b3_ref, o_ref):
    # x_ref : [TB, D]      bf16
    # w1_ref: [D, 1024]    bf16    b1_ref: [1, 1024] f32
    # w2_ref: [1024, 256]  bf16    b2_ref: [1, 256]  f32  (218 zero-padded)
    # w3_ref: [1, 256]     f32     (linear_3 weight as a zero-padded row)
    # b3_ref: [1, 1]       f32
    # o_ref : [TB, 128]    f32     (result broadcast across lanes)
    h1 = jnp.dot(x_ref[...], w1_ref[...],
                 preferred_element_type=jnp.float32) + b1_ref[...]
    h2 = jnp.dot(h1.astype(jnp.bfloat16), w2_ref[...],
                 preferred_element_type=jnp.float32) + b2_ref[...]
    # linear_3 has out_features == 1: weighted row-sum on the VPU/XLU instead
    # of a 1-of-256-columns MXU matmul, then lane-broadcast for a dense store.
    r = jnp.sum(h2 * w3_ref[...], axis=-1, keepdims=True) + b3_ref[...]
    o_ref[...] = jnp.broadcast_to(r, o_ref.shape).astype(o_ref.dtype)


def pcm_forward(x_flat, w1, b1, w2, b2, w3, b3, *, tb=128):
    """PredictConcentrationModel: three fused Linear layers in one Pallas call.

    x_flat: [B, max_len*hidden] float32
    returns: [B] float32   (matches .view(-1) in the PyTorch module)
    """
    B, D = x_flat.shape
    H1 = w1.shape[1]                       # 1024
    H2 = w2.shape[1]                       # 218
    H2p = _round_up(H2, 128)               # 256: lane-aligned hidden width

    # ---- parameter prep (bf16 MXU operands, f32 biases, zero padding) ----
    w1_bf = w1.astype(jnp.bfloat16)
    w2_bf = jnp.pad(w2, ((0, 0), (0, H2p - H2))).astype(jnp.bfloat16)
    b1_r = b1.reshape(1, H1).astype(jnp.float32)
    b2_r = jnp.pad(b2, (0, H2p - H2)).reshape(1, H2p).astype(jnp.float32)
    w3_row = jnp.pad(w3.reshape(-1), (0, H2p - H2)).reshape(1, H2p)
    w3_row = w3_row.astype(jnp.float32)
    b3_r = b3.reshape(1, 1).astype(jnp.float32)

    # ---- batch tiling: TB up to 128, rounded to the bf16 sublane tile -----
    tb = min(tb, _round_up(max(B, 1), 16))
    b_pad = _round_up(B, tb)
    x_bf = jnp.pad(x_flat, ((0, b_pad - B), (0, 0))).astype(jnp.bfloat16)

    grid = (b_pad // tb,)
    resident = lambda shape: pl.BlockSpec(shape, lambda i: (0, 0))

    cost = pl.CostEstimate(
        flops=2 * b_pad * (D * H1 + H1 * H2p + H2p),
        transcendentals=0,
        bytes_accessed=(x_bf.size * 2 + w1_bf.size * 2 + w2_bf.size * 2
                        + (b1_r.size + b2_r.size + w3_row.size + b3_r.size) * 4
                        + b_pad * 128 * 4),
    )

    out = pl.pallas_call(
        _pcm_kernel,
        out_shape=jax.ShapeDtypeStruct((b_pad, 128), jnp.float32),
        grid=grid,
        in_specs=[
            pl.BlockSpec((tb, D), lambda i: (i, 0)),     # x tile (pipelined)
            resident((D, H1)), resident((1, H1)),        # linear_1 (resident)
            resident((H1, H2p)), resident((1, H2p)),     # linear_2 (padded)
            resident((1, H2p)), resident((1, 1)),        # linear_3 (padded)
        ],
        out_specs=pl.BlockSpec((tb, 128), lambda i: (i, 0)),
        compiler_params=pltpu.CompilerParams(
            dimension_semantics=("parallel",)),
        cost_estimate=cost,
    )(x_bf, w1_bf, b1_r, w2_bf, b2_r, w3_row, b3_r)

    # Lane-dense [b_pad, 128] output: real result lives in column 0.
    return out[:B, 0]


def bertpcm_forward(tokens, embed_table, w1, b1, w2, b2, w3, b3,
                    max_len, hidden):
    """BERTPCM.forward:
        x = bert(x)                    -> [B, max_len, hidden]  (stand-in)
        x = x.view(-1, max_len*hidden) -> [B, max_len*hidden]
        return pcm(x).view(-1)         -> [B]
    """
    # BERT stand-in: deterministic embedding lookup (glue, plain JAX).
    bert_out = embed_table[tokens]                      # [B, max_len, hidden]
    x_flat = bert_out.reshape(-1, max_len * hidden)     # [B, max_len*hidden]
    return pcm_forward(x_flat, w1, b1, w2, b2, w3, b3)


def _init_linear(key, fan_in, fan_out):
    kw, kb = jax.random.split(key)
    bound = 1.0 / jnp.sqrt(float(fan_in))
    w = jax.random.uniform(kw, (fan_in, fan_out), jnp.float32, -bound, bound)
    b = jax.random.uniform(kb, (fan_out,), jnp.float32, -bound, bound)
    return w, b


if __name__ == "__main__":
    # Small, module-consistent shapes.
    batch = 2
    max_len = 8
    hidden = 32
    vocab = 100

    key = jax.random.PRNGKey(0)
    k_tok, k_emb, k1, k2, k3 = jax.random.split(key, 5)

    tokens = jax.random.randint(k_tok, (batch, max_len), 0, vocab,
                                dtype=jnp.int32)
    embed_table = jax.random.normal(k_emb, (vocab, hidden), jnp.float32) * 0.02

    # PredictConcentrationModel parameters.
    w1, b1 = _init_linear(k1, hidden * max_len, 1024)
    w2, b2 = _init_linear(k2, 1024, 218)
    w3, b3 = _init_linear(k3, 218, 1)

    fwd = jax.jit(bertpcm_forward, static_argnames=("max_len", "hidden"))
    out = fwd(tokens, embed_table, w1, b1, w2, b2, w3, b3,
              max_len=max_len, hidden=hidden)
    out = jax.block_until_ready(out)
    assert out.shape == (batch,)

    # References.
    bert_out = embed_table[tokens].reshape(-1, max_len * hidden)
    # (1) precision-mirrored reference (bf16 matmul operands, f32 accumulate).
    h1 = jnp.dot(bert_out.astype(jnp.bfloat16), w1.astype(jnp.bfloat16),
                 preferred_element_type=jnp.float32) + b1
    h2 = jnp.dot(h1.astype(jnp.bfloat16), w2.astype(jnp.bfloat16),
                 preferred_element_type=jnp.float32) + b2
    ref_mirror = (h2 @ w3 + b3).reshape(-1)
    # (2) full-f32 reference (module semantics) with bf16-level tolerance.
    ref_f32 = (((bert_out @ w1 + b1) @ w2 + b2) @ w3 + b3).reshape(-1)

    assert jnp.allclose(out, ref_mirror, atol=1e-3, rtol=1e-3)
    assert jnp.allclose(out, ref_f32, atol=5e-2, rtol=5e-2)

    print("KERNEL_OK")
</pallas_src>

<mosaic_0001>
module attributes {stable_mosaic.version = 11 : i64} {
  func.func @_pcm_kernel(%arg0: i32, %arg1: memref<16x256xbf16, #tpu.memory_space<vmem>>, %arg2: memref<256x1024xbf16, #tpu.memory_space<vmem>>, %arg3: memref<1x1024xf32, #tpu.memory_space<vmem>>, %arg4: memref<1024x256xbf16, #tpu.memory_space<vmem>>, %arg5: memref<1x256xf32, #tpu.memory_space<vmem>>, %arg6: memref<1x256xf32, #tpu.memory_space<vmem>>, %arg7: memref<1x1xf32, #tpu.memory_space<vmem>>, %arg8: memref<16x128xf32, #tpu.memory_space<vmem>>) attributes {dimension_semantics = [#tpu.dimension_semantics<parallel>], iteration_bounds = array<i64: 1>, scalar_prefetch = 0 : i64, scratch_operands = 0 : i64, tpu.core_type = #tpu.core_type<tc>, window_params = [{transform_indices = @transform_0, window_bounds = array<i64: 16, 256>}, {pipeline_mode = #tpu.pipeline_mode<synchronous>, transform_indices = @transform_1, window_bounds = array<i64: 256, 1024>}, {pipeline_mode = #tpu.pipeline_mode<synchronous>, transform_indices = @transform_2, window_bounds = array<i64: 1, 1024>}, {pipeline_mode = #tpu.pipeline_mode<synchronous>, transform_indices = @transform_3, window_bounds = array<i64: 1024, 256>}, {pipeline_mode = #tpu.pipeline_mode<synchronous>, transform_indices = @transform_4, window_bounds = array<i64: 1, 256>}, {pipeline_mode = #tpu.pipeline_mode<synchronous>, transform_indices = @transform_5, window_bounds = array<i64: 1, 256>}, {pipeline_mode = #tpu.pipeline_mode<synchronous>, transform_indices = @transform_6, window_bounds = array<i64: 1, 1>}, {transform_indices = @transform_7, window_bounds = array<i64: 16, 128>}]} {
    %c0 = arith.constant 0 : index
    %c0_0 = arith.constant 0 : index
    %0 = vector.load %arg1[%c0, %c0_0] : memref<16x256xbf16, #tpu.memory_space<vmem>>, vector<16x256xbf16>
    %c0_1 = arith.constant 0 : index
    %c0_2 = arith.constant 0 : index
    %1 = vector.load %arg2[%c0_1, %c0_2] : memref<256x1024xbf16, #tpu.memory_space<vmem>>, vector<256x1024xbf16>
    %cst = arith.constant dense<0.000000e+00> : vector<16x1024xf32>
    %2 = tpu.matmul %0, %1, %cst {dimension_numbers = #tpu.dot_dimension_numbers<[1], [0], [0], [1], [0, 0, 1, 1], [], []>} : vector<16x256xbf16>, vector<256x1024xbf16>, vector<16x1024xf32> -> vector<16x1024xf32>
    %c0_3 = arith.constant 0 : index
    %c0_4 = arith.constant 0 : index
    %3 = vector.load %arg3[%c0_3, %c0_4] : memref<1x1024xf32, #tpu.memory_space<vmem>>, vector<1x1024xf32>
    %4 = vector.broadcast %3 : vector<1x1024xf32> to vector<16x1024xf32>
    %5 = arith.addf %2, %4 : vector<16x1024xf32>
    %6 = arith.truncf %5 : vector<16x1024xf32> to vector<16x1024xbf16>
    %c0_5 = arith.constant 0 : index
    %c0_6 = arith.constant 0 : index
    %7 = vector.load %arg4[%c0_5, %c0_6] : memref<1024x256xbf16, #tpu.memory_space<vmem>>, vector<1024x256xbf16>
    %cst_7 = arith.constant dense<0.000000e+00> : vector<16x256xf32>
    %8 = tpu.matmul %6, %7, %cst_7 {dimension_numbers = #tpu.dot_dimension_numbers<[1], [0], [0], [1], [0, 0, 1, 1], [], []>} : vector<16x1024xbf16>, vector<1024x256xbf16>, vector<16x256xf32> -> vector<16x256xf32>
    %c0_8 = arith.constant 0 : index
    %c0_9 = arith.constant 0 : index
    %9 = vector.load %arg5[%c0_8, %c0_9] : memref<1x256xf32, #tpu.memory_space<vmem>>, vector<1x256xf32>
    %10 = vector.broadcast %9 : vector<1x256xf32> to vector<16x256xf32>
    %11 = arith.addf %8, %10 : vector<16x256xf32>
    %c0_10 = arith.constant 0 : index
    %c0_11 = arith.constant 0 : index
    %12 = vector.load %arg6[%c0_10, %c0_11] : memref<1x256xf32, #tpu.memory_space<vmem>>, vector<1x256xf32>
    %13 = vector.broadcast %12 : vector<1x256xf32> to vector<16x256xf32>
    %14 = arith.mulf %11, %13 : vector<16x256xf32>
    %cst_12 = arith.constant dense<0.000000e+00> : vector<16xf32>
    %15 = vector.multi_reduction <add>, %14, %cst_12 [1] : vector<16x256xf32> to vector<16xf32>
    %16 = vector.shape_cast %15 : vector<16xf32> to vector<16x1xf32>
    %c0_13 = arith.constant 0 : index
    %c0_14 = arith.constant 0 : index
    %17 = vector.load %arg7[%c0_13, %c0_14] : memref<1x1xf32, #tpu.memory_space<vmem>>, vector<1x1xf32>
    %18 = vector.broadcast %17 : vector<1x1xf32> to vector<16x1xf32>
    %19 = arith.addf %16, %18 : vector<16x1xf32>
    %20 = vector.shape_cast %19 : vector<16x1xf32> to vector<16x1xf32>
    %21 = vector.broadcast %20 : vector<16x1xf32> to vector<16x128xf32>
    %c0_15 = arith.constant 0 : index
    %c0_16 = arith.constant 0 : index
    %22 = vector.load %arg8[%c0_15, %c0_16] : memref<16x128xf32, #tpu.memory_space<vmem>>, vector<16x128xf32>
    tpu.vector_store %arg8[%c0_15, %c0_16], %21 {strides = array<i32>} : memref<16x128xf32, #tpu.memory_space<vmem>>, vector<16x128xf32>,
    return
  }
  func.func @transform_0(%arg0: i32) -> (i32, i32) {
    %c0_i32 = arith.constant 0 : i32
    %c0_i32_0 = arith.constant 0 : i32
    return %arg0, %c0_i32 : i32, i32
  }
  func.func @transform_1(%arg0: i32) -> (i32, i32) {
    %c0_i32 = arith.constant 0 : i32
    %c0_i32_0 = arith.constant 0 : i32
    %c0_i32_1 = arith.constant 0 : i32
    return %c0_i32, %c0_i32_0 : i32, i32
  }
  func.func @transform_2(%arg0: i32) -> (i32, i32) {
    %c0_i32 = arith.constant 0 : i32
    %c0_i32_0 = arith.constant 0 : i32
    %c0_i32_1 = arith.constant 0 : i32
    return %c0_i32, %c0_i32_0 : i32, i32
  }
  func.func @transform_3(%arg0: i32) -> (i32, i32) {
    %c0_i32 = arith.constant 0 : i32
    %c0_i32_0 = arith.constant 0 : i32
    %c0_i32_1 = arith.constant 0 : i32
    return %c0_i32, %c0_i32_0 : i32, i32
  }
  func.func @transform_4(%arg0: i32) -> (i32, i32) {
    %c0_i32 = arith.constant 0 : i32
    %c0_i32_0 = arith.constant 0 : i32
    %c0_i32_1 = arith.constant 0 : i32
    return %c0_i32, %c0_i32_0 : i32, i32
  }
  func.func @transform_5(%arg0: i32) -> (i32, i32) {
    %c0_i32 = arith.constant 0 : i32
    %c0_i32_0 = arith.constant 0 : i32
    %c0_i32_1 = arith.constant 0 : i32
    return %c0_i32, %c0_i32_0 : i32, i32
  }
  func.func @transform_6(%arg0: i32) -> (i32, i32) {
    %c0_i32 = arith.constant 0 : i32
    %c0_i32_0 = arith.constant 0 : i32
    %c0_i32_1 = arith.constant 0 : i32
    return %c0_i32, %c0_i32_0 : i32, i32
  }
  func.func @transform_7(%arg0: i32) -> (i32, i32) {
    %c0_i32 = arith.constant 0 : i32
    %c0_i32_0 = arith.constant 0 : i32
    return %arg0, %c0_i32 : i32, i32
  }
}

</mosaic_0001>

<bundles_post_ra>
// kernel: bertpcm_forward.1
= control target key start
LH: loop header
LB: loop body
LE: loop exit
PB: predicated region body
PF: predicated region fallthrough
CT: control target
= control target key end

     0   :  { %s5053_s1 = inlined_call_operand.vmem [shape: bf16[256,1024], index: 1, kind: input, shape index: {}]   ;;  %s5054_s0 = inlined_call_operand.vmem [shape: bf16[16,256], index: 0, kind: input, shape index: {}]   ;;  %s5055_s3 = inlined_call_operand.vmem [shape: bf16[1024,256], index: 3, kind: input, shape index: {}]   ;;  %s5056_s2 = inlined_call_operand.vmem [shape: f32[1,1024], index: 2, kind: input, shape index: {}]   ;;  %s5057_s4 = inlined_call_operand.vmem [shape: f32[1,256], index: 4, kind: input, shape index: {}]   ;;  %s5058_s6 = inlined_call_operand.<no memory space> [shape: f32[1,1], index: 6, kind: input, shape index: {}]   ;;  %s5059_s5 = inlined_call_operand.vmem [shape: f32[1,256], index: 5, kind: input, shape index: {}]   ;;  %s5060_s7 = inlined_call_operand.vmem [shape: f32[16,128], index: 7, kind: output, shape index: {}]  }
   0x1   :  { %v2328_v0 = vld [vmem:[%s5053_s1 + $0x1c0] sm:$0xf]  ;;  %v3184_v5 = vld [vmem:[%s5053_s1 + $0x1c4] sm:$0xf] }
   0x2   :  { %v3188_v1 = vld [vmem:[%s5053_s1 + $0x1dc] sm:$0xf0]  ;;  %v2330_v6 = vld [vmem:[%s5053_s1 + $0x1e0] sm:$0xf0] }
   0x3   :  { %v2584_v2 = vld [vmem:[%s5053_s1 + $0x3c0] sm:$0xf]  ;;  %v2329_v3 = vor.u32 %v3188_v1, %v2328_v0  ;;  %v2333_v8 = vor.u32 %v3184_v5, %v2330_v6  ;;  %v3248_v9 = vld [vmem:[%s5053_s1 + $0x3c4] sm:$0xf] }
   0x4   :  { %v3252_v4 = vld [vmem:[%s5053_s1 + $0x3dc] sm:$0xf0]  ;;  %v2586_v10 = vld [vmem:[%s5053_s1 + $0x3e0] sm:$0xf0] }
   0x5   :  { %v2585_v7 = vor.u32 %v3252_v4, %v2584_v2  ;;  %v2296_v11 = vld [vmem:[%s5053_s1 + $0x180] sm:$0xf]  ;;  %826 = vmatpush.bf16.msra.mxu0 %v2329_v3  ;;  %v2589_v12 = vor.u32 %v3248_v9, %v2586_v10  ;;  %854 = vmatpush.bf16.msra.mxu2 %v2333_v8  ;;  %v3176_v18 = vld [vmem:[%s5053_s1 + $0x184] sm:$0xf] }
   0x6   :  { %v3180_v13 = vld [vmem:[%s5053_s1 + $0x19c] sm:$0xf0]  ;;  %v2298_v19 = vld [vmem:[%s5053_s1 + $0x1a0] sm:$0xf0] }
   0x7   :  { %v2552_v14 = vld [vmem:[%s5053_s1 + $0x380] sm:$0xf]  ;;  %840 = vmatpush.bf16.msra.mxu1 %v2585_v7  ;;  %v2297_v16 = vor.u32 %v3180_v13, %v2296_v11  ;;  %v3240_v20 = vld [vmem:[%s5053_s1 + $0x384] sm:$0xf]  ;;  %868 = vmatpush.bf16.msra.mxu3 %v2589_v12  ;;  %v2301_v21 = vor.u32 %v3176_v18, %v2298_v19 }
   0x8   :  { %v3244_v15 = vld [vmem:[%s5053_s1 + $0x39c] sm:$0xf0]  ;;  %v2554_v22 = vld [vmem:[%s5053_s1 + $0x3a0] sm:$0xf0] }
   0x9   :  { %v2553_v17 = vor.u32 %v3244_v15, %v2552_v14  ;;  %v2264_v23 = vld [vmem:[%s5053_s1 + $0x140] sm:$0xf]  ;;  %v2557_v25 = vor.u32 %v3240_v20, %v2554_v22  ;;  %v3168_v28 = vld [vmem:[%s5053_s1 + $0x144] sm:$0xf]  ;;  %827 = vmatpush.bf16.msra.mxu0 %v2297_v16  ;;  %855 = vmatpush.bf16.msra.mxu2 %v2301_v21 }
   0xa   :  { %v3172_v24 = vld [vmem:[%s5053_s1 + $0x15c] sm:$0xf0]  ;;  %v2266_v30 = vld [vmem:[%s5053_s1 + $0x160] sm:$0xf0] }
   0xb   :  { %v2520_v26 = vld [vmem:[%s5053_s1 + $0x340] sm:$0xf]  ;;  %v2265_v29 = vor.u32 %v3172_v24, %v2264_v23  ;;  %v3232_v31 = vld [vmem:[%s5053_s1 + $0x344] sm:$0xf]  ;;  %841 = vmatpush.bf16.msra.mxu1 %v2553_v17  ;;  %v2269_v34 = vor.u32 %v3168_v28, %v2266_v30  ;;  %869 = vmatpush.bf16.msra.mxu3 %v2557_v25  ;;  %v2336_v28 = vld [vmem:[%s5053_s1 + $0x1c8] sm:$0xf] }
   0xc   :  { %v3236_v27 = vld [vmem:[%s5053_s1 + $0x35c] sm:$0xf0]  ;;  %v2522_v32 = vld [vmem:[%s5053_s1 + $0x360] sm:$0xf0]  ;;  %v2592_v30 = vld [vmem:[%s5053_s1 + $0x3c8] sm:$0xf] }
   0xd   :  { %v2521_v33 = vor.u32 %v3236_v27, %v2520_v26  ;;  %v2232_v35 = vld [vmem:[%s5053_s1 + $0x100] sm:$0xf]  ;;  %v2525_v38 = vor.u32 %v3232_v31, %v2522_v32  ;;  %v3160_v40 = vld [vmem:[%s5053_s1 + $0x104] sm:$0xf]  ;;  %828 = vmatpush.bf16.msra.mxu0 %v2265_v29  ;;  %856 = vmatpush.bf16.msra.mxu2 %v2269_v34  ;;  %v3189_v29 = vld [vmem:[%s5053_s1 + $0x1e4] sm:$0xf0] }
   0xe   :  { %v3164_v36 = vld [vmem:[%s5053_s1 + $0x11c] sm:$0xf0]  ;;  %v2234_v41 = vld [vmem:[%s5053_s1 + $0x120] sm:$0xf0]  ;;  %v3253_v32 = vld [vmem:[%s5053_s1 + $0x3e4] sm:$0xf0] }
   0xf   :  { %v2488_v37 = vld [vmem:[%s5053_s1 + $0x300] sm:$0xf]  ;;  %v3224_v42 = vld [vmem:[%s5053_s1 + $0x304] sm:$0xf]  ;;  %v2233_v44 = vor.u32 %v3164_v36, %v2232_v35  ;;  %842 = vmatpush.bf16.msra.mxu1 %v2521_v33  ;;  %v2237_v46 = vor.u32 %v3160_v40, %v2234_v41  ;;  %870 = vmatpush.bf16.msra.mxu3 %v2525_v38  ;;  %v3185_v33 = vld [vmem:[%s5053_s1 + $0x1cc] sm:$0xf]  ;;  %v2337_v40 = vor.u32 %v3189_v29, %v2336_v28 }
  0x10   :  { %v3228_v39 = vld [vmem:[%s5053_s1 + $0x31c] sm:$0xf0]  ;;  %v2490_v43 = vld [vmem:[%s5053_s1 + $0x320] sm:$0xf0]  ;;  %v2338_v34 = vld [vmem:[%s5053_s1 + $0x1e8] sm:$0xf0] }
  0x11   :  { %v2489_v45 = vor.u32 %v3228_v39, %v2488_v37  ;;  %v2200_v47 = vld [vmem:[%s5053_s1 + $0xc0] sm:$0xf]  ;;  %v2493_v50 = vor.u32 %v3224_v42, %v2490_v43  ;;  %v3152_v52 = vld [vmem:[%s5053_s1 + $0xc4] sm:$0xf]  ;;  %829 = vmatpush.bf16.msra.mxu0 %v2233_v44  ;;  %857 = vmatpush.bf16.msra.mxu2 %v2237_v46  ;;  %v3249_v37 = vld [vmem:[%s5053_s1 + $0x3cc] sm:$0xf]  ;;  %v2593_v43 = vor.u32 %v3253_v32, %v2592_v30 }
  0x12   :  { %v3156_v48 = vld [vmem:[%s5053_s1 + $0xdc] sm:$0xf0]  ;;  %v2202_v53 = vld [vmem:[%s5053_s1 + $0xe0] sm:$0xf0]  ;;  %v2594_v38 = vld [vmem:[%s5053_s1 + $0x3e8] sm:$0xf0]  ;;  %v2341_v44 = vor.u32 %v3185_v33, %v2338_v34 }
  0x13   :  { %v2456_v49 = vld [vmem:[%s5053_s1 + $0x2c0] sm:$0xf]  ;;  %v3216_v54 = vld [vmem:[%s5053_s1 + $0x2c4] sm:$0xf]  ;;  %v2201_v56 = vor.u32 %v3156_v48, %v2200_v47  ;;  %843 = vmatpush.bf16.msra.mxu1 %v2489_v45  ;;  %v2205_v58 = vor.u32 %v3152_v52, %v2202_v53  ;;  %871 = vmatpush.bf16.msra.mxu3 %v2493_v50  ;;  %v2304_v41 = vld [vmem:[%s5053_s1 + $0x188] sm:$0xf]  ;;  %v2597_v48 = vor.u32 %v3249_v37, %v2594_v38 }
  0x14   :  { %v3220_v51 = vld [vmem:[%s5053_s1 + $0x2dc] sm:$0xf0]  ;;  %v2458_v55 = vld [vmem:[%s5053_s1 + $0x2e0] sm:$0xf0]  ;;  %v3181_v42 = vld [vmem:[%s5053_s1 + $0x1a4] sm:$0xf0] }
  0x15   :  { %v2457_v57 = vor.u32 %v3220_v51, %v2456_v49  ;;  %v2168_v59 = vld [vmem:[%s5053_s1 + $0x80] sm:$0xf]  ;;  %v2461_v62 = vor.u32 %v3216_v54, %v2458_v55  ;;  %v3144_v0 = vld [vmem:[%s5053_s1 + $0x84] sm:$0xf]  ;;  %830 = vmatpush.bf16.msra.mxu0 %v2201_v56  ;;  %858 = vmatpush.bf16.msra.mxu2 %v2205_v58  ;;  %v2560_v45 = vld [vmem:[%s5053_s1 + $0x388] sm:$0xf]  ;;  %v2305_v55 = vor.u32 %v3181_v42, %v2304_v41 }
  0x16   :  { %v3148_v60 = vld [vmem:[%s5053_s1 + $0x9c] sm:$0xf0]  ;;  %v2170_v1 = vld [vmem:[%s5053_s1 + $0xa0] sm:$0xf0]  ;;  %v3245_v46 = vld [vmem:[%s5053_s1 + $0x3a4] sm:$0xf0] }
  0x17   :  { %v2424_v61 = vld [vmem:[%s5053_s1 + $0x280] sm:$0xf]  ;;  %v3208_v2 = vld [vmem:[%s5053_s1 + $0x284] sm:$0xf]  ;;  %v2169_v4 = vor.u32 %v3148_v60, %v2168_v59  ;;  %844 = vmatpush.bf16.msra.mxu1 %v2457_v57  ;;  %v2173_v6 = vor.u32 %v3144_v0, %v2170_v1  ;;  %872 = vmatpush.bf16.msra.mxu3 %v2461_v62  ;;  %v3177_v47 = vld [vmem:[%s5053_s1 + $0x18c] sm:$0xf]  ;;  %v2561_v58 = vor.u32 %v3245_v46, %v2560_v45 }
  0x18   :  { %v3212_v63 = vld [vmem:[%s5053_s1 + $0x29c] sm:$0xf0]  ;;  %v2426_v3 = vld [vmem:[%s5053_s1 + $0x2a0] sm:$0xf0]  ;;  %v2306_v49 = vld [vmem:[%s5053_s1 + $0x1a8] sm:$0xf0] }
  0x19   :  { %v2425_v5 = vor.u32 %v3212_v63, %v2424_v61  ;;  %v2136_v7 = vld [vmem:[%s5053_s1 + $0x40] sm:$0xf]  ;;  %v2429_v10 = vor.u32 %v3208_v2, %v2426_v3  ;;  %v3136_v12 = vld [vmem:[%s5053_s1 + $0x44] sm:$0xf]  ;;  %831 = vmatpush.bf16.msra.mxu0 %v2169_v4  ;;  %859 = vmatpush.bf16.msra.mxu2 %v2173_v6  ;;  %v3241_v50 = vld [vmem:[%s5053_s1 + $0x38c] sm:$0xf]  ;;  %v2309_v59 = vor.u32 %v3177_v47, %v2306_v49 }
  0x1a   :  { %v3140_v8 = vld [vmem:[%s5053_s1 + $0x5c] sm:$0xf0]  ;;  %v2138_v13 = vld [vmem:[%s5053_s1 + $0x60] sm:$0xf0]  ;;  %v2562_v51 = vld [vmem:[%s5053_s1 + $0x3a8] sm:$0xf0] }
  0x1b   :  { %v2392_v9 = vld [vmem:[%s5053_s1 + $0x240] sm:$0xf]  ;;  %v3200_v14 = vld [vmem:[%s5053_s1 + $0x244] sm:$0xf]  ;;  %v2137_v16 = vor.u32 %v3140_v8, %v2136_v7  ;;  %845 = vmatpush.bf16.msra.mxu1 %v2425_v5  ;;  %v2141_v20 = vor.u32 %v3136_v12, %v2138_v13  ;;  %873 = vmatpush.bf16.msra.mxu3 %v2429_v10  ;;  %v3127_v53 = vld [vmem:[%s5054_s0 + $0x4] sm:$0xf0]  ;;  %v2565_v0 = vor.u32 %v3241_v50, %v2562_v51 }
  0x1c   :  { %v3204_v11 = vld [vmem:[%s5053_s1 + $0x25c] sm:$0xf0]  ;;  %v2394_v15 = vld [vmem:[%s5053_s1 + $0x260] sm:$0xf0]  ;;  %v2098_v57 = vld [vmem:[%s5054_s0 + $0x8] sm:$0xf0] }
  0x1d   :  { %v2104_v17 = vld [vmem:[%s5053_s1] sm:$0xf]  ;;  %v2393_v19 = vor.u32 %v3204_v11, %v2392_v9  ;;  %v3128_v23 = vld [vmem:[%s5053_s1 + $0x4] sm:$0xf]  ;;  %v2397_v24 = vor.u32 %v3200_v14, %v2394_v15  ;;  %832 = vmatpush.bf16.msra.mxu0 %v2137_v16  ;;  %860 = vmatpush.bf16.msra.mxu2 %v2141_v20  ;;  %v2272_v60 = vld [vmem:[%s5053_s1 + $0x148] sm:$0xf] }
  0x1e   :  { %v3132_v18 = vld [vmem:[%s5053_s1 + $0x1c] sm:$0xf0]  ;;  %v2106_v25 = vld [vmem:[%s5053_s1 + $0x20] sm:$0xf0]  ;;  %v3173_v61 = vld [vmem:[%s5053_s1 + $0x164] sm:$0xf0] }
  0x1f   :  { %v2360_v21 = vld [vmem:[%s5053_s1 + $0x200] sm:$0xf]  ;;  %v3192_v26 = vld [vmem:[%s5053_s1 + $0x204] sm:$0xf]  ;;  %v2105_v31 = vor.u32 %v3132_v18, %v2104_v17  ;;  %846 = vmatpush.bf16.msra.mxu1 %v2393_v19  ;;  %v2109_v36 = vor.u32 %v3128_v23, %v2106_v25  ;;  %874 = vmatpush.bf16.msra.mxu3 %v2397_v24  ;;  %v2528_v62 = vld [vmem:[%s5053_s1 + $0x348] sm:$0xf]  ;;  %v2273_v6 = vor.u32 %v3173_v61, %v2272_v60 }
  0x20   :  { %v3196_v22 = vld [vmem:[%s5053_s1 + $0x21c] sm:$0xf0]  ;;  %v2362_v27 = vld [vmem:[%s5053_s1 + $0x220] sm:$0xf0]  ;;  %v3237_v1 = vld [vmem:[%s5053_s1 + $0x364] sm:$0xf0] }
  0x21   :  { %v2361_v35 = vor.u32 %v3196_v22, %v2360_v21  ;;  %v2365_v39 = vor.u32 %v3192_v26, %v2362_v27  ;;  %833 = vmatpush.bf16.msra.mxu0 %v2105_v31  ;;  %861 = vmatpush.bf16.msra.mxu2 %v2109_v36  ;;  %v2096_v52 = vld [vmem:[%s5054_s0] sm:$0xf]  ;;  %v3126_v54 = vld [vmem:[%s5054_s0 + $0x4] sm:$0xf]  ;;  %v3169_v2 = vld [vmem:[%s5053_s1 + $0x14c] sm:$0xf]  ;;  %v2529_v7 = vor.u32 %v3237_v1, %v2528_v62 }
  0x22   :  { %v3678_v56 = vor.u32 %v3127_v53, %v2096_v52  ;;  %v3692_v63 = vor.u32 %v3126_v54, %v2098_v57  ;;  %v2274_v3 = vld [vmem:[%s5053_s1 + $0x168] sm:$0xf0]  ;;  %v2240_v9 = vld [vmem:[%s5053_s1 + $0x108] sm:$0xf] }
  0x23   :  { %847 = vmatpush.bf16.msra.mxu1 %v2361_v35  ;;  %875 = vmatpush.bf16.msra.mxu3 %v2365_v39  ;;  %v3233_v4 = vld [vmem:[%s5053_s1 + $0x34c] sm:$0xf]  ;;  %v2277_v8 = vor.u32 %v3169_v2, %v2274_v3  ;;  %v3165_v10 = vld [vmem:[%s5053_s1 + $0x124] sm:$0xf0] }
  0x24   :  { %862 = vmatmul.bf16.vlgmr.msra.gmra.mxu2 %v3678_v56  ;;  %v2530_v5 = vld [vmem:[%s5053_s1 + $0x368] sm:$0xf0]  ;;  %834 = vmatmul.bf16.vlgmr.msra.gmra.mxu0 %v3678_v56  ;;  %v2496_v11 = vld [vmem:[%s5053_s1 + $0x308] sm:$0xf]  ;;  %v2241_v18 = vor.u32 %v3165_v10, %v2240_v9  ;;  %v3186_v9 = vld [vmem:[%s5053_s1 + $0x1d4] sm:$0xf] }
  0x25   :  { %882 = vmatpush.bf16.msrb.mxu0 %v2337_v40  ;;  %910 = vmatpush.bf16.msrb.mxu2 %v2341_v44  ;;  %v2533_v12 = vor.u32 %v3233_v4, %v2530_v5  ;;  %v3229_v13 = vld [vmem:[%s5053_s1 + $0x324] sm:$0xf0]  ;;  %v3161_v14 = vld [vmem:[%s5053_s1 + $0x10c] sm:$0xf]  ;;  %v2344_v4 = vld [vmem:[%s5053_s1 + $0x1d0] sm:$0xf] }
  0x26   :  { %876 = vmatmul.bf16.vlgmr.msra.gmra.mxu3 %v3692_v63  ;;  %848 = vmatmul.bf16.vlgmr.msra.gmra.mxu1 %v3692_v63  ;;  %v2242_v15 = vld [vmem:[%s5053_s1 + $0x128] sm:$0xf0]  ;;  %v2497_v19 = vor.u32 %v3229_v13, %v2496_v11  ;;  %v2208_v21 = vld [vmem:[%s5053_s1 + $0xc8] sm:$0xf]  ;;  %v3190_v5 = vld [vmem:[%s5053_s1 + $0x1ec] sm:$0xf0] }
  0x27   :  { %896 = vmatpush.bf16.msrb.mxu1 %v2593_v43  ;;  %924 = vmatpush.bf16.msrb.mxu3 %v2597_v48  ;;  %v3225_v16 = vld [vmem:[%s5053_s1 + $0x30c] sm:$0xf]  ;;  %v2245_v20 = vor.u32 %v3161_v14, %v2242_v15  ;;  %v3157_v22 = vld [vmem:[%s5053_s1 + $0xe4] sm:$0xf0]  ;;  %v2346_v10 = vld [vmem:[%s5053_s1 + $0x1f0] sm:$0xf0] }
  0x28   :  { %v2498_v17 = vld [vmem:[%s5053_s1 + $0x328] sm:$0xf0]  ;;  %v2464_v23 = vld [vmem:[%s5053_s1 + $0x2c8] sm:$0xf]  ;;  %v2209_v30 = vor.u32 %v3157_v22, %v2208_v21  ;;  %v3250_v13 = vld [vmem:[%s5053_s1 + $0x3d4] sm:$0xf] }
  0x29   :  { %883 = vmatpush.bf16.msrb.mxu0 %v2305_v55  ;;  %911 = vmatpush.bf16.msrb.mxu2 %v2309_v59  ;;  %v2501_v24 = vor.u32 %v3225_v16, %v2498_v17  ;;  %v3221_v25 = vld [vmem:[%s5053_s1 + $0x2e4] sm:$0xf0]  ;;  %v3153_v26 = vld [vmem:[%s5053_s1 + $0xcc] sm:$0xf]  ;;  %v2602_v14 = vld [vmem:[%s5053_s1 + $0x3f0] sm:$0xf0]  ;;  %v2345_v16 = vor.u32 %v3190_v5, %v2344_v4 }
  0x2a   :  { %v2210_v27 = vld [vmem:[%s5053_s1 + $0xe8] sm:$0xf0]  ;;  %v2465_v31 = vor.u32 %v3221_v25, %v2464_v23  ;;  %v2176_v33 = vld [vmem:[%s5053_s1 + $0x88] sm:$0xf]  ;;  %v2568_v21 = vld [vmem:[%s5053_s1 + $0x390] sm:$0xf]  ;;  %v2605_v22 = vor.u32 %v3250_v13, %v2602_v14 }
  0x2b   :  { %897 = vmatpush.bf16.msrb.mxu1 %v2561_v58  ;;  %925 = vmatpush.bf16.msrb.mxu3 %v2565_v0  ;;  %v3217_v28 = vld [vmem:[%s5053_s1 + $0x2cc] sm:$0xf]  ;;  %v2213_v32 = vor.u32 %v3153_v26, %v2210_v27  ;;  %v3149_v34 = vld [vmem:[%s5053_s1 + $0xa4] sm:$0xf0]  ;;  %v3246_v23 = vld [vmem:[%s5053_s1 + $0x3ac] sm:$0xf0] }
  0x2c   :  { %v2466_v29 = vld [vmem:[%s5053_s1 + $0x2e8] sm:$0xf0]  ;;  %v2432_v35 = vld [vmem:[%s5053_s1 + $0x288] sm:$0xf]  ;;  %v2177_v42 = vor.u32 %v3149_v34, %v2176_v33  ;;  %v2314_v25 = vld [vmem:[%s5053_s1 + $0x1b0] sm:$0xf0] }
  0x2d   :  { %884 = vmatpush.bf16.msrb.mxu0 %v2273_v6  ;;  %912 = vmatpush.bf16.msrb.mxu2 %v2277_v8  ;;  %v2469_v36 = vor.u32 %v3217_v28, %v2466_v29  ;;  %v3213_v37 = vld [vmem:[%s5053_s1 + $0x2a4] sm:$0xf0]  ;;  %v3145_v38 = vld [vmem:[%s5053_s1 + $0x8c] sm:$0xf]  ;;  %v2600_v6 = vld [vmem:[%s5053_s1 + $0x3d0] sm:$0xf]  ;;  %v2569_v29 = vor.u32 %v3246_v23, %v2568_v21 }
  0x2e   :  { %v2178_v39 = vld [vmem:[%s5053_s1 + $0xa8] sm:$0xf0]  ;;  %v2433_v43 = vor.u32 %v3213_v37, %v2432_v35  ;;  %v2144_v45 = vld [vmem:[%s5053_s1 + $0x48] sm:$0xf]  ;;  %v3254_v8 = vld [vmem:[%s5053_s1 + $0x3ec] sm:$0xf0] }
  0x2f   :  { %898 = vmatpush.bf16.msrb.mxu1 %v2529_v7  ;;  %926 = vmatpush.bf16.msrb.mxu3 %v2533_v12  ;;  %v3209_v40 = vld [vmem:[%s5053_s1 + $0x28c] sm:$0xf]  ;;  %v2181_v44 = vor.u32 %v3145_v38, %v2178_v39  ;;  %v3141_v46 = vld [vmem:[%s5053_s1 + $0x64] sm:$0xf0]  ;;  %v2601_v17 = vor.u32 %v3254_v8, %v2600_v6  ;;  %v3242_v26 = vld [vmem:[%s5053_s1 + $0x394] sm:$0xf] }
  0x30   :  { %v2434_v41 = vld [vmem:[%s5053_s1 + $0x2a8] sm:$0xf0]  ;;  %v2400_v47 = vld [vmem:[%s5053_s1 + $0x248] sm:$0xf]  ;;  %v2145_v54 = vor.u32 %v3141_v46, %v2144_v45  ;;  %v2570_v27 = vld [vmem:[%s5053_s1 + $0x3b0] sm:$0xf0] }
  0x31   :  { %885 = vmatpush.bf16.msrb.mxu0 %v2241_v18  ;;  %913 = vmatpush.bf16.msrb.mxu2 %v2245_v20  ;;  %v2437_v48 = vor.u32 %v3209_v40, %v2434_v41  ;;  %v3205_v49 = vld [vmem:[%s5053_s1 + $0x264] sm:$0xf0]  ;;  %v3137_v50 = vld [vmem:[%s5053_s1 + $0x4c] sm:$0xf]  ;;  %v2349_v18 = vor.u32 %v3186_v9, %v2346_v10  ;;  %v3182_v20 = vld [vmem:[%s5053_s1 + $0x1ac] sm:$0xf0]  ;;  %v2573_v34 = vor.u32 %v3242_v26, %v2570_v27 }
  0x32   :  { %v2146_v51 = vld [vmem:[%s5053_s1 + $0x68] sm:$0xf0]  ;;  %v2112_v55 = vld [vmem:[%s5053_s1 + $0x8] sm:$0xf]  ;;  %v2401_v58 = vor.u32 %v3205_v49, %v2400_v47  ;;  %v2536_v33 = vld [vmem:[%s5053_s1 + $0x350] sm:$0xf] }
  0x33   :  { %899 = vmatpush.bf16.msrb.mxu1 %v2497_v19  ;;  %927 = vmatpush.bf16.msrb.mxu3 %v2501_v24  ;;  %v3201_v52 = vld [vmem:[%s5053_s1 + $0x24c] sm:$0xf]  ;;  %v3133_v57 = vld [vmem:[%s5053_s1 + $0x24] sm:$0xf0]  ;;  %v2149_v59 = vor.u32 %v3137_v50, %v2146_v51  ;;  %v2312_v19 = vld [vmem:[%s5053_s1 + $0x190] sm:$0xf] }
  0x34   :  { %v2402_v53 = vld [vmem:[%s5053_s1 + $0x268] sm:$0xf0]  ;;  %v2368_v60 = vld [vmem:[%s5053_s1 + $0x208] sm:$0xf]  ;;  %v2113_v7 = vor.u32 %v3133_v57, %v2112_v55  ;;  %v3178_v24 = vld [vmem:[%s5053_s1 + $0x194] sm:$0xf]  ;;  %v2313_v28 = vor.u32 %v3182_v20, %v2312_v19 }
  0x35   :  { %886 = vmatpush.bf16.msrb.mxu0 %v2209_v30  ;;  %914 = vmatpush.bf16.msrb.mxu2 %v2213_v32  ;;  %v3197_v61 = vld [vmem:[%s5053_s1 + $0x224] sm:$0xf0]  ;;  %v3129_v62 = vld [vmem:[%s5053_s1 + $0xc] sm:$0xf]  ;;  %v2405_v0 = vor.u32 %v3201_v52, %v2402_v53  ;;  %v2317_v30 = vor.u32 %v3178_v24, %v2314_v25  ;;  %v3174_v32 = vld [vmem:[%s5053_s1 + $0x16c] sm:$0xf0] }
  0x36   :  { %v2114_v1 = vld [vmem:[%s5053_s1 + $0x28] sm:$0xf0]  ;;  %v2369_v11 = vor.u32 %v3197_v61, %v2368_v60  ;;  %v3238_v35 = vld [vmem:[%s5053_s1 + $0x36c] sm:$0xf0]  ;;  %v2282_v37 = vld [vmem:[%s5053_s1 + $0x170] sm:$0xf0] }
  0x37   :  { %900 = vmatpush.bf16.msrb.mxu1 %v2465_v31  ;;  %928 = vmatpush.bf16.msrb.mxu3 %v2469_v36  ;;  %v3193_v2 = vld [vmem:[%s5053_s1 + $0x20c] sm:$0xf]  ;;  %v2117_v12 = vor.u32 %v3129_v62, %v2114_v1  ;;  %v2280_v31 = vld [vmem:[%s5053_s1 + $0x150] sm:$0xf]  ;;  %v3170_v36 = vld [vmem:[%s5053_s1 + $0x154] sm:$0xf]  ;;  %v2537_v41 = vor.u32 %v3238_v35, %v2536_v33 }
  0x38   :  { %v2370_v3 = vld [vmem:[%s5053_s1 + $0x228] sm:$0xf0]  ;;  %v3234_v38 = vld [vmem:[%s5053_s1 + $0x354] sm:$0xf]  ;;  %v2281_v40 = vor.u32 %v3174_v32, %v2280_v31  ;;  %v2504_v45 = vld [vmem:[%s5053_s1 + $0x310] sm:$0xf] }
  0x39   :  { %887 = vmatpush.bf16.msrb.mxu0 %v2177_v42  ;;  %915 = vmatpush.bf16.msrb.mxu2 %v2181_v44  ;;  %v2373_v15 = vor.u32 %v3193_v2, %v2370_v3  ;;  %v2538_v39 = vld [vmem:[%s5053_s1 + $0x370] sm:$0xf0]  ;;  %v2285_v42 = vor.u32 %v3170_v36, %v2282_v37  ;;  %v3166_v44 = vld [vmem:[%s5053_s1 + $0x12c] sm:$0xf0] }
  0x3a   :  { %v2541_v46 = vor.u32 %v3234_v38, %v2538_v39  ;;  %v3230_v47 = vld [vmem:[%s5053_s1 + $0x32c] sm:$0xf0]  ;;  %v2250_v49 = vld [vmem:[%s5053_s1 + $0x130] sm:$0xf0]  ;;  %v2352_v38 = vld [vmem:[%s5053_s1 + $0x1d8] sm:$0xf] }
  0x3b   :  { %901 = vmatpush.bf16.msrb.mxu1 %v2433_v43  ;;  %929 = vmatpush.bf16.msrb.mxu3 %v2437_v48  ;;  %v2248_v43 = vld [vmem:[%s5053_s1 + $0x110] sm:$0xf]  ;;  %v3162_v48 = vld [vmem:[%s5053_s1 + $0x114] sm:$0xf]  ;;  %v2505_v53 = vor.u32 %v3230_v47, %v2504_v45  ;;  %v3191_v39 = vld [vmem:[%s5053_s1 + $0x1f4] sm:$0xf0] }
  0x3c   :  { %v3226_v50 = vld [vmem:[%s5053_s1 + $0x314] sm:$0xf]  ;;  %v2249_v52 = vor.u32 %v3166_v44, %v2248_v43  ;;  %v2216_v55 = vld [vmem:[%s5053_s1 + $0xd0] sm:$0xf]  ;;  %v3187_v43 = vld [vmem:[%s5053_s1 + $0x1dc] sm:$0xf] }
  0x3d   :  { %888 = vmatpush.bf16.msrb.mxu0 %v2145_v54  ;;  %916 = vmatpush.bf16.msrb.mxu2 %v2149_v59  ;;  %v2506_v51 = vld [vmem:[%s5053_s1 + $0x330] sm:$0xf0]  ;;  %v2253_v54 = vor.u32 %v3162_v48, %v2250_v49  ;;  %v3158_v57 = vld [vmem:[%s5053_s1 + $0xec] sm:$0xf0]  ;;  %v2354_v44 = vld [vmem:[%s5053_s1 + $0x1f8] sm:$0xf0] }
  0x3e   :  { %v2509_v59 = vor.u32 %v3226_v50, %v2506_v51  ;;  %v3222_v60 = vld [vmem:[%s5053_s1 + $0x2ec] sm:$0xf0]  ;;  %v3154_v61 = vld [vmem:[%s5053_s1 + $0xd4] sm:$0xf]  ;;  %v2217_v2 = vor.u32 %v3158_v57, %v2216_v55  ;;  %v3251_v47 = vld [vmem:[%s5053_s1 + $0x3dc] sm:$0xf]  ;;  %v2353_v50 = vor.u32 %v3191_v39, %v2352_v38 }
  0x3f   :  { %902 = vmatpush.bf16.msrb.mxu1 %v2401_v58  ;;  %930 = vmatpush.bf16.msrb.mxu3 %v2405_v0  ;;  %v2472_v58 = vld [vmem:[%s5053_s1 + $0x2d0] sm:$0xf]  ;;  %v2218_v62 = vld [vmem:[%s5053_s1 + $0xf0] sm:$0xf0]  ;;  %v2610_v48 = vld [vmem:[%s5053_s1 + $0x3f8] sm:$0xf0] }
  0x40   :  { %v3218_v0 = vld [vmem:[%s5053_s1 + $0x2d4] sm:$0xf]  ;;  %v2473_v3 = vor.u32 %v3222_v60, %v2472_v58  ;;  %v2221_v4 = vor.u32 %v3154_v61, %v2218_v62  ;;  %v2184_v5 = vld [vmem:[%s5053_s1 + $0x90] sm:$0xf]  ;;  %v2576_v55 = vld [vmem:[%s5053_s1 + $0x398] sm:$0xf]  ;;  %v2613_v57 = vor.u32 %v3251_v47, %v2610_v48 }
  0x41   :  { %889 = vmatpush.bf16.msrb.mxu0 %v2113_v7  ;;  %917 = vmatpush.bf16.msrb.mxu2 %v2117_v12  ;;  %v2474_v1 = vld [vmem:[%s5053_s1 + $0x2f0] sm:$0xf0]  ;;  %v3150_v6 = vld [vmem:[%s5053_s1 + $0xac] sm:$0xf0]  ;;  %v3247_v58 = vld [vmem:[%s5053_s1 + $0x3b4] sm:$0xf0] }
  0x42   :  { %v2440_v7 = vld [vmem:[%s5053_s1 + $0x290] sm:$0xf]  ;;  %v2477_v8 = vor.u32 %v3218_v0, %v2474_v1  ;;  %v3146_v10 = vld [vmem:[%s5053_s1 + $0x94] sm:$0xf]  ;;  %v2185_v14 = vor.u32 %v3150_v6, %v2184_v5  ;;  %v2322_v60 = vld [vmem:[%s5053_s1 + $0x1b8] sm:$0xf0]  ;;  %v2577_v1 = vor.u32 %v3247_v58, %v2576_v55 }
  0x43   :  { %903 = vmatpush.bf16.msrb.mxu1 %v2369_v11  ;;  %931 = vmatpush.bf16.msrb.mxu3 %v2373_v15  ;;  %v3214_v9 = vld [vmem:[%s5053_s1 + $0x2ac] sm:$0xf0]  ;;  %v2186_v11 = vld [vmem:[%s5053_s1 + $0xb0] sm:$0xf0]  ;;  %v3243_v61 = vld [vmem:[%s5053_s1 + $0x39c] sm:$0xf] }
  0x44   :  { %890 = vmatmul.bf16.vlgmr.msrb.gmra.mxu0 %v3678_v56  ;;  %918 = vmatmul.bf16.vlgmr.msrb.gmra.mxu2 %v3678_v56  ;;  %v3210_v12 = vld [vmem:[%s5053_s1 + $0x294] sm:$0xf]  ;;  %v2441_v15 = vor.u32 %v3214_v9, %v2440_v7  ;;  %v2408_v19 = vld [vmem:[%s5053_s1 + $0x250] sm:$0xf]  ;;  %v2578_v62 = vld [vmem:[%s5053_s1 + $0x3b8] sm:$0xf0] }
  0x45   :  { %938 = vmatpush.bf16.msra.mxu0 %v2345_v16  ;;  %966 = vmatpush.bf16.msra.mxu2 %v2349_v18  ;;  %v2442_v13 = vld [vmem:[%s5053_s1 + $0x2b0] sm:$0xf0]  ;;  %v2189_v16 = vor.u32 %v3146_v10, %v2186_v11  ;;  %v3142_v18 = vld [vmem:[%s5053_s1 + $0x6c] sm:$0xf0]  ;;  %v2544_v5 = vld [vmem:[%s5053_s1 + $0x358] sm:$0xf]  ;;  %v2581_v6 = vor.u32 %v3243_v61, %v2578_v62 }
  0x46   :  { %904 = vmatmul.bf16.vlgmr.msrb.gmra.mxu1 %v3692_v63  ;;  %932 = vmatmul.bf16.vlgmr.msrb.gmra.mxu3 %v3692_v63  ;;  %v2445_v20 = vor.u32 %v3210_v12, %v2442_v13  ;;  %v3206_v21 = vld [vmem:[%s5053_s1 + $0x26c] sm:$0xf0]  ;;  %v2154_v23 = vld [vmem:[%s5053_s1 + $0x70] sm:$0xf0]  ;;  %v3239_v7 = vld [vmem:[%s5053_s1 + $0x374] sm:$0xf0] }
  0x47   :  { %952 = vmatpush.bf16.msra.mxu1 %v2601_v17  ;;  %980 = vmatpush.bf16.msra.mxu3 %v2605_v22  ;;  %v2152_v17 = vld [vmem:[%s5053_s1 + $0x50] sm:$0xf]  ;;  %v3138_v22 = vld [vmem:[%s5053_s1 + $0x54] sm:$0xf]  ;;  %v2290_v9 = vld [vmem:[%s5053_s1 + $0x178] sm:$0xf0]  ;;  %v2545_v13 = vor.u32 %v3239_v7, %v2544_v5 }
  0x48   :  { %v3202_v24 = vld [vmem:[%s5053_s1 + $0x254] sm:$0xf]  ;;  %v2153_v26 = vor.u32 %v3142_v18, %v2152_v17  ;;  %v2120_v27 = vld [vmem:[%s5053_s1 + $0x10] sm:$0xf]  ;;  %v3235_v10 = vld [vmem:[%s5053_s1 + $0x35c] sm:$0xf] }
  0x49   :  { %939 = vmatpush.bf16.msra.mxu0 %v2313_v28  ;;  %967 = vmatpush.bf16.msra.mxu2 %v2317_v30  ;;  %v2410_v25 = vld [vmem:[%s5053_s1 + $0x270] sm:$0xf0]  ;;  %v3134_v28 = vld [vmem:[%s5053_s1 + $0x2c] sm:$0xf0]  ;;  %v2157_v30 = vor.u32 %v3138_v22, %v2154_v23  ;;  %v2546_v11 = vld [vmem:[%s5053_s1 + $0x378] sm:$0xf0] }
  0x4a   :  { %v2376_v31 = vld [vmem:[%s5053_s1 + $0x210] sm:$0xf]  ;;  %v3130_v33 = vld [vmem:[%s5053_s1 + $0x14] sm:$0xf]  ;;  %v2512_v17 = vld [vmem:[%s5053_s1 + $0x318] sm:$0xf]  ;;  %v2549_v18 = vor.u32 %v3235_v10, %v2546_v11 }
  0x4b   :  { %953 = vmatpush.bf16.msra.mxu1 %v2569_v29  ;;  %981 = vmatpush.bf16.msra.mxu3 %v2573_v34  ;;  %v2409_v29 = vor.u32 %v3206_v21, %v2408_v19  ;;  %v3198_v32 = vld [vmem:[%s5053_s1 + $0x22c] sm:$0xf0]  ;;  %v2413_v34 = vor.u32 %v3202_v24, %v2410_v25  ;;  %v2122_v35 = vld [vmem:[%s5053_s1 + $0x30] sm:$0xf0]  ;;  %v3231_v19 = vld [vmem:[%s5053_s1 + $0x334] sm:$0xf0] }
  0x4c   :  { %v3194_v36 = vld [vmem:[%s5053_s1 + $0x214] sm:$0xf]  ;;  %v2377_v45 = vor.u32 %v3198_v32, %v2376_v31  ;;  %v2258_v21 = vld [vmem:[%s5053_s1 + $0x138] sm:$0xf0]  ;;  %v2513_v25 = vor.u32 %v3231_v19, %v2512_v17  ;;  %v3223_v31 = vld [vmem:[%s5053_s1 + $0x2f4] sm:$0xf0] }
  0x4d   :  { %940 = vmatpush.bf16.msra.mxu0 %v2281_v40  ;;  %968 = vmatpush.bf16.msra.mxu2 %v2285_v42  ;;  %v2378_v37 = vld [vmem:[%s5053_s1 + $0x230] sm:$0xf0]  ;;  %v2608_v40 = vld [vmem:[%s5053_s1 + $0x3d8] sm:$0xf]  ;;  %v3227_v22 = vld [vmem:[%s5053_s1 + $0x31c] sm:$0xf] }
  0x4e   :  { %v3255_v42 = vld [vmem:[%s5053_s1 + $0x3f4] sm:$0xf0]  ;;  %v2381_v49 = vor.u32 %v3194_v36, %v2378_v37  ;;  %v2514_v23 = vld [vmem:[%s5053_s1 + $0x338] sm:$0xf0]  ;;  %v2672_v10 = vld [vmem:[%s5055_s3 + $0x70] sm:$0xf] }
  0x4f   :  { %954 = vmatpush.bf16.msra.mxu1 %v2537_v41  ;;  %982 = vmatpush.bf16.msra.mxu3 %v2541_v46  ;;  %v2121_v41 = vor.u32 %v3134_v28, %v2120_v27  ;;  %v2125_v46 = vor.u32 %v3130_v33, %v2122_v35  ;;  %v2609_v51 = vor.u32 %v3255_v42, %v2608_v40  ;;  %v2224_v27 = vld [vmem:[%s5053_s1 + $0xd8] sm:$0xf]  ;;  %v3155_v32 = vld [vmem:[%s5053_s1 + $0xdc] sm:$0xf]  ;;  %v2664_v19 = vld [vmem:[%s5055_s3 + $0x60] sm:$0xf] }
  0x50   :  { %v3159_v28 = vld [vmem:[%s5053_s1 + $0xf4] sm:$0xf0]  ;;  %v2226_v33 = vld [vmem:[%s5053_s1 + $0xf8] sm:$0xf0] }
  0x51   :  { %941 = vmatpush.bf16.msra.mxu0 %v2249_v52  ;;  %969 = vmatpush.bf16.msra.mxu2 %v2253_v54  ;;  %v2357_v52 = vor.u32 %v3187_v43, %v2354_v44  ;;  %v3183_v54 = vld [vmem:[%s5053_s1 + $0x1b4] sm:$0xf0]  ;;  %v2482_v35 = vld [vmem:[%s5053_s1 + $0x2f8] sm:$0xf0]  ;;  %v2225_v36 = vor.u32 %v3159_v28, %v2224_v27  ;;  %v2229_v38 = vor.u32 %v3155_v32, %v2226_v33  ;;  %v2720_v28 = vld [vmem:[%s5055_s3 + $0xd0] sm:$0xf] }
  0x52   :  { %v2192_v39 = vld [vmem:[%s5053_s1 + $0x98] sm:$0xf]  ;;  %v3147_v44 = vld [vmem:[%s5053_s1 + $0x9c] sm:$0xf]  ;;  %v2712_v33 = vld [vmem:[%s5055_s3 + $0xc0] sm:$0xf] }
  0x53   :  { %955 = vmatpush.bf16.msra.mxu1 %v2505_v53  ;;  %983 = vmatpush.bf16.msra.mxu3 %v2509_v59  ;;  %v2320_v53 = vld [vmem:[%s5053_s1 + $0x198] sm:$0xf]  ;;  %v3179_v59 = vld [vmem:[%s5053_s1 + $0x19c] sm:$0xf] }
  0x54   :  { %v2321_v0 = vor.u32 %v3183_v54, %v2320_v53  ;;  %v3151_v40 = vld [vmem:[%s5053_s1 + $0xb4] sm:$0xf0]  ;;  %v2450_v47 = vld [vmem:[%s5053_s1 + $0x2b8] sm:$0xf0] }
  0x55   :  { %942 = vmatpush.bf16.msra.mxu0 %v2217_v2  ;;  %970 = vmatpush.bf16.msra.mxu2 %v2221_v4  ;;  %v2325_v2 = vor.u32 %v3179_v59, %v2322_v60  ;;  %v3175_v4 = vld [vmem:[%s5053_s1 + $0x174] sm:$0xf0]  ;;  %v2193_v48 = vor.u32 %v3151_v40, %v2192_v39  ;;  %v2162_v58 = vld [vmem:[%s5053_s1 + $0x78] sm:$0xf0] }
  0x56   :  { %v3215_v43 = vld [vmem:[%s5053_s1 + $0x2b4] sm:$0xf0]  ;;  %v3203_v59 = vld [vmem:[%s5053_s1 + $0x25c] sm:$0xf] }
  0x57   :  { %956 = vmatpush.bf16.msra.mxu1 %v2473_v3  ;;  %984 = vmatpush.bf16.msra.mxu3 %v2477_v8  ;;  %v2288_v3 = vld [vmem:[%s5053_s1 + $0x158] sm:$0xf]  ;;  %v3171_v8 = vld [vmem:[%s5053_s1 + $0x15c] sm:$0xf] }
  0x58   :  { %v2289_v12 = vor.u32 %v3175_v4, %v2288_v3  ;;  %v2416_v53 = vld [vmem:[%s5053_s1 + $0x258] sm:$0xf]  ;;  %v2418_v60 = vld [vmem:[%s5053_s1 + $0x278] sm:$0xf0] }
  0x59   :  { %943 = vmatpush.bf16.msra.mxu0 %v2185_v14  ;;  %971 = vmatpush.bf16.msra.mxu2 %v2189_v16  ;;  %v2293_v14 = vor.u32 %v3171_v8, %v2290_v9  ;;  %v3167_v16 = vld [vmem:[%s5053_s1 + $0x134] sm:$0xf0]  ;;  %v2421_v5 = vor.u32 %v3203_v59, %v2418_v60  ;;  %v2130_v7 = vld [vmem:[%s5053_s1 + $0x38] sm:$0xf0]  ;;  %v2624_v59 = vld [vmem:[%s5055_s3 + $0x10] sm:$0xf] }
  0x5a   :  { %v3207_v55 = vld [vmem:[%s5053_s1 + $0x274] sm:$0xf0]  ;;  %v3195_v8 = vld [vmem:[%s5053_s1 + $0x21c] sm:$0xf] }
  0x5b   :  { %957 = vmatpush.bf16.msra.mxu1 %v2441_v15  ;;  %985 = vmatpush.bf16.msra.mxu3 %v2445_v20  ;;  %v2256_v15 = vld [vmem:[%s5053_s1 + $0x118] sm:$0xf]  ;;  %v3163_v20 = vld [vmem:[%s5053_s1 + $0x11c] sm:$0xf] }
  0x5c   :  { %v2257_v24 = vor.u32 %v3167_v16, %v2256_v15  ;;  %v2128_v62 = vld [vmem:[%s5053_s1 + $0x18] sm:$0xf]  ;;  %v2386_v9 = vld [vmem:[%s5053_s1 + $0x238] sm:$0xf0] }
  0x5d   :  { %944 = vmatpush.bf16.msra.mxu0 %v2153_v26  ;;  %972 = vmatpush.bf16.msra.mxu2 %v2157_v30  ;;  %v2261_v26 = vor.u32 %v3163_v20, %v2258_v21  ;;  %v2517_v30 = vor.u32 %v3227_v22, %v2514_v23  ;;  %v2384_v3 = vld [vmem:[%s5053_s1 + $0x218] sm:$0xf]  ;;  %v2389_v17 = vor.u32 %v3195_v8, %v2386_v9  ;;  %v3269_v20 = vld [vmem:[%s5055_s3 + $0x64] sm:$0xf0]  ;;  %v2728_v22 = vld [vmem:[%s5055_s3 + $0xe0] sm:$0xf] }
  0x5e   :  { %v3199_v4 = vld [vmem:[%s5053_s1 + $0x234] sm:$0xf0]  ;;  %v3285_v23 = vld [vmem:[%s5055_s3 + $0xe4] sm:$0xf0]  ;;  %v2616_v8 = vld [vmem:[%s5055_s3] sm:$0xf] }
  0x5f   :  { %958 = vmatpush.bf16.msra.mxu1 %v2409_v29  ;;  %986 = vmatpush.bf16.msra.mxu3 %v2413_v34  ;;  %v2480_v29 = vld [vmem:[%s5053_s1 + $0x2d8] sm:$0xf]  ;;  %v3219_v34 = vld [vmem:[%s5053_s1 + $0x2dc] sm:$0xf]  ;;  %v2385_v15 = vor.u32 %v3199_v4, %v2384_v3  ;;  %v2729_v27 = vor.u32 %v3285_v23, %v2728_v22  ;;  %v3317_v3 = vld [vmem:[%s5055_s3 + $0x1e4] sm:$0xf0] }
  0x60   :  { %v2481_v37 = vor.u32 %v3223_v31, %v2480_v29  ;;  %v2485_v42 = vor.u32 %v3219_v34, %v2482_v35  ;;  %v3271_v11 = vld [vmem:[%s5055_s3 + $0x74] sm:$0xf0]  ;;  %v2648_v31 = vld [vmem:[%s5055_s3 + $0x40] sm:$0xf]  ;;  %v2800_v34 = vld [vmem:[%s5055_s3 + $0x170] sm:$0xf] }
  0x61   :  { %945 = vmatpush.bf16.msra.mxu0 %v2121_v41  ;;  %973 = vmatpush.bf16.msra.mxu2 %v2125_v46  ;;  %v2448_v41 = vld [vmem:[%s5053_s1 + $0x298] sm:$0xf]  ;;  %v3211_v46 = vld [vmem:[%s5053_s1 + $0x29c] sm:$0xf]  ;;  %v3257_v9 = vld [vmem:[%s5055_s3 + $0x4] sm:$0xf0] }
  0x62   :  { %v2453_v54 = vor.u32 %v3211_v46, %v2450_v47  ;;  %v3283_v29 = vld [vmem:[%s5055_s3 + $0xd4] sm:$0xf0]  ;;  %v3261_v46 = vld [vmem:[%s5055_s3 + $0x24] sm:$0xf0] }
  0x63   :  { %959 = vmatpush.bf16.msra.mxu1 %v2377_v45  ;;  %987 = vmatpush.bf16.msra.mxu3 %v2381_v49  ;;  %v2194_v45 = vld [vmem:[%s5053_s1 + $0xb8] sm:$0xf0]  ;;  %v2449_v49 = vor.u32 %v3215_v43, %v2448_v41  ;;  %v2721_v32 = vor.u32 %v3283_v29, %v2720_v28  ;;  %v2704_v41 = vld [vmem:[%s5055_s3 + $0xb0] sm:$0xf]  ;;  %v3259_v60 = vld [vmem:[%s5055_s3 + $0x14] sm:$0xf0] }
  0x64   :  { %946 = vmatmul.bf16.vlgmr.msra.gmra.mxu0 %v3678_v56  ;;  %974 = vmatmul.bf16.vlgmr.msra.gmra.mxu2 %v3678_v56  ;;  %v2625_v4 = vor.u32 %v3259_v60, %v2624_v59  ;;  %v3349_v28 = vld [vmem:[%s5055_s3 + $0x2e4] sm:$0xf0]  ;;  %v3311_v59 = vld [vmem:[%s5055_s3 + $0x1b4] sm:$0xf0] }
  0x65   :  { %994 = vmatpush.bf16.msrb.mxu0 %v2353_v50  ;;  %1022 = vmatpush.bf16.msrb.mxu2 %v2357_v52  ;;  %v2197_v50 = vor.u32 %v3147_v44, %v2194_v45  ;;  %v3143_v52 = vld [vmem:[%s5053_s1 + $0x74] sm:$0xf0]  ;;  %v2632_v44 = vld [vmem:[%s5055_s3 + $0x20] sm:$0xf] }
  0x66   :  { %960 = vmatmul.bf16.vlgmr.msra.gmra.mxu1 %v3692_v63  ;;  %988 = vmatmul.bf16.vlgmr.msra.gmra.mxu3 %v3692_v63  ;;  %v2792_v45 = vld [vmem:[%s5055_s3 + $0x160] sm:$0xf] }
  0x67   :  { %1008 = vmatpush.bf16.msrb.mxu1 %v2609_v51  ;;  %1036 = vmatpush.bf16.msrb.mxu3 %v2613_v57  ;;  %v2160_v51 = vld [vmem:[%s5053_s1 + $0x58] sm:$0xf]  ;;  %v3139_v57 = vld [vmem:[%s5053_s1 + $0x5c] sm:$0xf] }
  0x68   :  { %v2161_v61 = vor.u32 %v3143_v52, %v2160_v51  ;;  %v2864_v52 = vld [vmem:[%s5055_s3 + $0x1f0] sm:$0xf] }
  0x69   :  { %995 = vmatpush.bf16.msrb.mxu0 %v2321_v0  ;;  %1023 = vmatpush.bf16.msrb.mxu2 %v2325_v2  ;;  %v2417_v0 = vor.u32 %v3207_v55, %v2416_v53  ;;  %v3135_v2 = vld [vmem:[%s5053_s1 + $0x34] sm:$0xf0]  ;;  %v2633_v55 = vor.u32 %v3261_v46, %v2632_v44  ;;  %v3313_v44 = vld [vmem:[%s5055_s3 + $0x1c4] sm:$0xf0] }
  0x6a   :  { %v3319_v53 = vld [vmem:[%s5055_s3 + $0x1f4] sm:$0xf0] }
  0x6b   :  { %1009 = vmatpush.bf16.msrb.mxu1 %v2577_v1  ;;  %1037 = vmatpush.bf16.msrb.mxu3 %v2581_v6  ;;  %v2165_v1 = vor.u32 %v3139_v57, %v2162_v58  ;;  %v3131_v6 = vld [vmem:[%s5053_s1 + $0x1c] sm:$0xf]  ;;  %v2784_v57 = vld [vmem:[%s5055_s3 + $0x150] sm:$0xf]  ;;  %v3299_v58 = vld [vmem:[%s5055_s3 + $0x154] sm:$0xf0] }
  0x6c   :  { %v2133_v16 = vor.u32 %v3131_v6, %v2130_v7  ;;  %v2776_v6 = vld [vmem:[%s5055_s3 + $0x140] sm:$0xf]  ;;  %v3297_v7 = vld [vmem:[%s5055_s3 + $0x144] sm:$0xf0] }
  0x6d   :  { %996 = vmatpush.bf16.msrb.mxu0 %v2289_v12  ;;  %1024 = vmatpush.bf16.msrb.mxu2 %v2293_v14  ;;  %v2129_v12 = vor.u32 %v3135_v2, %v2128_v62  ;;  %v3287_v14 = vld [vmem:[%s5055_s3 + $0xf4] sm:$0xf0]  ;;  %v2785_v62 = vor.u32 %v3299_v58, %v2784_v57  ;;  %v2856_v2 = vld [vmem:[%s5055_s3 + $0x1e0] sm:$0xf]  ;;  %v2832_v58 = vld [vmem:[%s5055_s3 + $0x1b0] sm:$0xf] }
  0x6e   :  { %v2833_v60 = vor.u32 %v3311_v59, %v2832_v58  ;;  %v2666_v58 = vld [vmem:[%s5055_s3 + $0x68] sm:$0xf0]  ;;  %v2936_v59 = vld [vmem:[%s5055_s3 + $0x280] sm:$0xf] }
  0x6f   :  { %1010 = vmatpush.bf16.msrb.mxu1 %v2545_v13  ;;  %1038 = vmatpush.bf16.msrb.mxu3 %v2549_v18  ;;  %v2736_v13 = vld [vmem:[%s5055_s3 + $0xf0] sm:$0xf]  ;;  %v2673_v18 = vor.u32 %v3271_v11, %v2672_v10 }
  0x70   :  { %v2737_v21 = vor.u32 %v3287_v14, %v2736_v13  ;;  %v2928_v10 = vld [vmem:[%s5055_s3 + $0x270] sm:$0xf]  ;;  %v3335_v13 = vld [vmem:[%s5055_s3 + $0x274] sm:$0xf0]  ;;  %v2680_v14 = vld [vmem:[%s5055_s3 + $0x80] sm:$0xf] }
  0x71   :  { %997 = vmatpush.bf16.msrb.mxu0 %v2257_v24  ;;  %1025 = vmatpush.bf16.msrb.mxu2 %v2261_v26  ;;  %v2665_v24 = vor.u32 %v3269_v20, %v2664_v19  ;;  %v3267_v26 = vld [vmem:[%s5055_s3 + $0x54] sm:$0xf0]  ;;  %v2848_v19 = vld [vmem:[%s5055_s3 + $0x1d0] sm:$0xf] }
  0x72   :  { %v3315_v20 = vld [vmem:[%s5055_s3 + $0x1d4] sm:$0xf0] }
  0x73   :  { %1011 = vmatpush.bf16.msrb.mxu1 %v2513_v25  ;;  %1039 = vmatpush.bf16.msrb.mxu3 %v2517_v30  ;;  %v2656_v25 = vld [vmem:[%s5055_s3 + $0x50] sm:$0xf]  ;;  %v2849_v23 = vor.u32 %v3315_v20, %v2848_v19  ;;  %v2744_v19 = vld [vmem:[%s5055_s3 + $0x100] sm:$0xf]  ;;  %v3289_v20 = vld [vmem:[%s5055_s3 + $0x104] sm:$0xf0] }
  0x74   :  { %v2657_v30 = vor.u32 %v3267_v26, %v2656_v25  ;;  %v3333_v25 = vld [vmem:[%s5055_s3 + $0x264] sm:$0xf0] }
  0x75   :  { %998 = vmatpush.bf16.msrb.mxu0 %v2225_v36  ;;  %1026 = vmatpush.bf16.msrb.mxu2 %v2229_v38  ;;  %v3303_v36 = vld [vmem:[%s5055_s3 + $0x174] sm:$0xf0] }
  0x76   :  { %v3263_v38 = vld [vmem:[%s5055_s3 + $0x34] sm:$0xf0]  ;;  %v2801_v40 = vor.u32 %v3303_v36, %v2800_v34  ;;  %v3329_v34 = vld [vmem:[%s5055_s3 + $0x244] sm:$0xf0] }
  0x77   :  { %1012 = vmatpush.bf16.msrb.mxu1 %v2481_v37  ;;  %1040 = vmatpush.bf16.msrb.mxu3 %v2485_v42  ;;  %v2640_v37 = vld [vmem:[%s5055_s3 + $0x30] sm:$0xf]  ;;  %v3279_v42 = vld [vmem:[%s5055_s3 + $0xb4] sm:$0xf0] }
  0x78   :  { %v2641_v43 = vor.u32 %v3263_v38, %v2640_v37  ;;  %v2705_v47 = vor.u32 %v3279_v42, %v2704_v41  ;;  %v3295_v36 = vld [vmem:[%s5055_s3 + $0x134] sm:$0xf0]  ;;  %v2976_v38 = vld [vmem:[%s5055_s3 + $0x2d0] sm:$0xf] }
  0x79   :  { %999 = vmatpush.bf16.msrb.mxu0 %v2193_v48  ;;  %1027 = vmatpush.bf16.msrb.mxu2 %v2197_v50  ;;  %v2696_v48 = vld [vmem:[%s5055_s3 + $0xa0] sm:$0xf]  ;;  %v3277_v50 = vld [vmem:[%s5055_s3 + $0xa4] sm:$0xf0] }
  0x7b   :  { %1013 = vmatpush.bf16.msrb.mxu1 %v2449_v49  ;;  %1041 = vmatpush.bf16.msrb.mxu3 %v2453_v54  ;;  %v3301_v49 = vld [vmem:[%s5055_s3 + $0x164] sm:$0xf0]  ;;  %v2865_v54 = vor.u32 %v3319_v53, %v2864_v52  ;;  %v2968_v52 = vld [vmem:[%s5055_s3 + $0x2c0] sm:$0xf] }
  0x7c   :  { %v2793_v51 = vor.u32 %v3301_v49, %v2792_v45  ;;  %v2760_v49 = vld [vmem:[%s5055_s3 + $0x120] sm:$0xf]  ;;  %v3345_v53 = vld [vmem:[%s5055_s3 + $0x2c4] sm:$0xf0] }
  0x7d   :  { %1000 = vmatpush.bf16.msrb.mxu0 %v2161_v61  ;;  %1028 = vmatpush.bf16.msrb.mxu2 %v2165_v1  ;;  %v2697_v61 = vor.u32 %v3277_v50, %v2696_v48  ;;  %v3275_v1 = vld [vmem:[%s5055_s3 + $0x94] sm:$0xf0] }
  0x7e   :  { %v3327_v48 = vld [vmem:[%s5055_s3 + $0x234] sm:$0xf0] }
  0x7f   :  { %1014 = vmatpush.bf16.msrb.mxu1 %v2417_v0  ;;  %1042 = vmatpush.bf16.msrb.mxu3 %v2421_v5  ;;  %v2688_v0 = vld [vmem:[%s5055_s3 + $0x90] sm:$0xf]  ;;  %v2857_v5 = vor.u32 %v3317_v3, %v2856_v2  ;;  %v3291_v3 = vld [vmem:[%s5055_s3 + $0x114] sm:$0xf0] }
  0x80   :  { %v2689_v11 = vor.u32 %v3275_v1, %v2688_v0  ;;  %v2752_v2 = vld [vmem:[%s5055_s3 + $0x110] sm:$0xf] }
  0x81   :  { %1001 = vmatpush.bf16.msrb.mxu0 %v2129_v12  ;;  %1029 = vmatpush.bf16.msrb.mxu2 %v2133_v16  ;;  %v2777_v12 = vor.u32 %v3297_v7, %v2776_v6  ;;  %v2992_v16 = vld [vmem:[%s5055_s3 + $0x2f0] sm:$0xf]  ;;  %v2753_v6 = vor.u32 %v3291_v3, %v2752_v2  ;;  %v2738_v3 = vld [vmem:[%s5055_s3 + $0xf8] sm:$0xf0] }
  0x82   :  { %v2960_v7 = vld [vmem:[%s5055_s3 + $0x2b0] sm:$0xf] }
  0x83   :  { %1015 = vmatpush.bf16.msrb.mxu1 %v2385_v15  ;;  %1043 = vmatpush.bf16.msrb.mxu3 %v2389_v17  ;;  %v3273_v15 = vld [vmem:[%s5055_s3 + $0x84] sm:$0xf0]  ;;  %v3351_v17 = vld [vmem:[%s5055_s3 + $0x2f4] sm:$0xf0] }
  0x84   :  { %1002 = vmatmul.bf16.vlgmr.msrb.gmra.mxu0 %v3678_v56  ;;  %1030 = vmatmul.bf16.vlgmr.msrb.gmra.mxu2 %v3678_v56  ;;  %v3265_v56 = vld [vmem:[%s5055_s3 + $0x44] sm:$0xf0]  ;;  %v2681_v22 = vor.u32 %v3273_v15, %v2680_v14  ;;  %v2993_v26 = vor.u32 %v3351_v17, %v2992_v16  ;;  %v2880_v15 = vld [vmem:[%s5055_s3 + $0x210] sm:$0xf] }
  0x85   :  { %1832 = vmatpush.bf16.msra.mxu0 %v2673_v18  ;;  %v2649_v35 = vor.u32 %v3265_v56, %v2648_v31  ;;  %1860 = vmatpush.bf16.msra.mxu2 %v2801_v40  ;;  %v2617_v18 = vor.u32 %v3257_v9, %v2616_v8  ;;  %v3331_v31 = vld [vmem:[%s5055_s3 + $0x254] sm:$0xf0] }
  0x86   :  { %1016 = vmatmul.bf16.vlgmr.msrb.gmra.mxu1 %v3692_v63  ;;  %1044 = vmatmul.bf16.vlgmr.msrb.gmra.mxu3 %v3692_v63  ;;  %v3281_v63 = vld [vmem:[%s5055_s3 + $0xc4] sm:$0xf0]  ;;  %v3343_v8 = vld [vmem:[%s5055_s3 + $0x2b4] sm:$0xf0] }
  0x87   :  { %1846 = vmatpush.bf16.msra.mxu1 %v2737_v21  ;;  %v2713_v39 = vor.u32 %v3281_v63, %v2712_v33  ;;  %1874 = vmatpush.bf16.msra.mxu3 %v2865_v54  ;;  %v2929_v21 = vor.u32 %v3335_v13, %v2928_v10  ;;  %v4400_v33 = vld [vmem:[%s5056_s2] sm:$0xff]  ;;  %v2961_v10 = vor.u32 %v3343_v8, %v2960_v7 }
  0x88   :  { %v2904_v63 = vld [vmem:[%s5055_s3 + $0x240] sm:$0xf]  ;;  %v160_v40 = vperm.slane %v4400_v33, 0 }
  0x89   :  { %1833 = vmatpush.bf16.msra.mxu0 %v2665_v24  ;;  %1861 = vmatpush.bf16.msra.mxu2 %v2793_v51  ;;  %v2920_v24 = vld [vmem:[%s5055_s3 + $0x260] sm:$0xf]  ;;  %v2905_v41 = vor.u32 %v3329_v34, %v2904_v63  ;;  %v3293_v51 = vld [vmem:[%s5055_s3 + $0x124] sm:$0xf0] }
  0x8a   :  { %v2921_v29 = vor.u32 %v3333_v25, %v2920_v24  ;;  %v2761_v54 = vor.u32 %v3293_v51, %v2760_v49  ;;  %v2952_v24 = vld [vmem:[%s5055_s3 + $0x2a0] sm:$0xf]  ;;  %v3341_v25 = vld [vmem:[%s5055_s3 + $0x2a4] sm:$0xf0] }
  0x8b   :  { %1847 = vmatpush.bf16.msra.mxu1 %v2729_v27  ;;  %1875 = vmatpush.bf16.msra.mxu3 %v2857_v5  ;;  %v2984_v27 = vld [vmem:[%s5055_s3 + $0x2e0] sm:$0xf] }
  0x8c   :  { %v2985_v56 = vor.u32 %v3349_v28, %v2984_v27  ;;  %v2953_v27 = vor.u32 %v3341_v25, %v2952_v24  ;;  %v2816_v28 = vld [vmem:[%s5055_s3 + $0x190] sm:$0xf]  ;;  %v3379_v24 = vld [vmem:[%s5055_s3 + $0x3d4] sm:$0xf0]  ;;  %v3282_v25 = vld [vmem:[%s5055_s3 + $0xd4] sm:$0xf] }
  0x8d   :  { %1834 = vmatpush.bf16.msra.mxu0 %v2657_v30  ;;  %1862 = vmatpush.bf16.msra.mxu2 %v2785_v62  ;;  %v2912_v30 = vld [vmem:[%s5055_s3 + $0x250] sm:$0xf]  ;;  %v3325_v62 = vld [vmem:[%s5055_s3 + $0x224] sm:$0xf0] }
  0x8f   :  { %1848 = vmatpush.bf16.msra.mxu1 %v2721_v32  ;;  %1876 = vmatpush.bf16.msra.mxu3 %v2849_v23  ;;  %v2913_v32 = vor.u32 %v3331_v31, %v2912_v30  ;;  %v2745_v23 = vor.u32 %v3289_v20, %v2744_v19 }
  0x91   :  { %1835 = vmatpush.bf16.msra.mxu0 %v2649_v35  ;;  %1863 = vmatpush.bf16.msra.mxu2 %v2777_v12  ;;  %v2768_v35 = vld [vmem:[%s5055_s3 + $0x130] sm:$0xf]  ;;  %v3309_v12 = vld [vmem:[%s5055_s3 + $0x1a4] sm:$0xf0] }
  0x92   :  { %v2769_v37 = vor.u32 %v3295_v36, %v2768_v35  ;;  %v3056_v35 = vld [vmem:[%s5055_s3 + $0x370] sm:$0xf]  ;;  %v3367_v36 = vld [vmem:[%s5055_s3 + $0x374] sm:$0xf0] }
  0x93   :  { %1849 = vmatpush.bf16.msra.mxu1 %v2713_v39  ;;  %v3347_v39 = vld [vmem:[%s5055_s3 + $0x2d4] sm:$0xf0] }
  0x94   :  { %v2977_v42 = vor.u32 %v3347_v39, %v2976_v38 }
  0x95   :  { %1836 = vmatpush.bf16.msra.mxu0 %v2641_v43  ;;  %v2840_v43 = vld [vmem:[%s5055_s3 + $0x1c0] sm:$0xf]  ;;  %1864 = vmatpush.bf16.msra.mxu2 %v2769_v37  ;;  %v3270_v37 = vld [vmem:[%s5055_s3 + $0x74] sm:$0xf] }
  0x96   :  { %v2841_v46 = vor.u32 %v3313_v44, %v2840_v43  ;;  %v2944_v43 = vld [vmem:[%s5055_s3 + $0x290] sm:$0xf]  ;;  %v3339_v44 = vld [vmem:[%s5055_s3 + $0x294] sm:$0xf0] }
  0x97   :  { %1850 = vmatpush.bf16.msra.mxu1 %v2705_v47  ;;  %v2896_v47 = vld [vmem:[%s5055_s3 + $0x230] sm:$0xf] }
  0x98   :  { %1877 = vmatpush.bf16.msra.mxu3 %v2841_v46  ;;  %v2897_v57 = vor.u32 %v3327_v48, %v2896_v47  ;;  %v2808_v46 = vld [vmem:[%s5055_s3 + $0x180] sm:$0xf]  ;;  %v3305_v47 = vld [vmem:[%s5055_s3 + $0x184] sm:$0xf0] }
  0x99   :  { %1837 = vmatpush.bf16.msra.mxu0 %v2633_v55  ;;  %v2969_v55 = vor.u32 %v3345_v53, %v2968_v52  ;;  %1865 = vmatpush.bf16.msra.mxu2 %v2761_v54  ;;  %v3048_v52 = vld [vmem:[%s5055_s3 + $0x360] sm:$0xf]  ;;  %v3365_v53 = vld [vmem:[%s5055_s3 + $0x364] sm:$0xf0]  ;;  %v3268_v54 = vld [vmem:[%s5055_s3 + $0x64] sm:$0xf] }
  0x9b   :  { %1851 = vmatpush.bf16.msra.mxu1 %v2697_v61  ;;  %v2888_v61 = vld [vmem:[%s5055_s3 + $0x220] sm:$0xf] }
  0x9c   :  { %1878 = vmatpush.bf16.msra.mxu3 %v2833_v60  ;;  %v2889_v9 = vor.u32 %v3325_v62, %v2888_v61  ;;  %v3337_v60 = vld [vmem:[%s5055_s3 + $0x284] sm:$0xf0]  ;;  %v3120_v62 = vld [vmem:[%s5055_s3 + $0x3f0] sm:$0xf] }
  0x9d   :  { %1838 = vmatpush.bf16.msra.mxu0 %v2625_v4  ;;  %v161_v4 = vperm.slane %v4400_v33, 1  ;;  %1866 = vmatpush.bf16.msra.mxu2 %v2753_v6  ;;  %v2937_v61 = vor.u32 %v3337_v60, %v2936_v59  ;;  %v2669_v6 = vor.u32 %v3268_v54, %v2666_v58  ;;  %v163_v54 = vperm.slane %v4400_v33, 3  ;;  %v2706_v59 = vld [vmem:[%s5055_s3 + $0xb8] sm:$0xf0] }
  0x9f   :  { %1852 = vmatpush.bf16.msra.mxu1 %v2689_v11  ;;  %v2824_v11 = vld [vmem:[%s5055_s3 + $0x1a0] sm:$0xf] }
  0xa0   :  { %v2825_v14 = vor.u32 %v3309_v12, %v2824_v11  ;;  %v3112_v11 = vld [vmem:[%s5055_s3 + $0x3e0] sm:$0xf]  ;;  %v3381_v12 = vld [vmem:[%s5055_s3 + $0x3e4] sm:$0xf0] }
  0xa1   :  { %1839 = vmatpush.bf16.msra.mxu0 %v2617_v18  ;;  %v835_v45 = vpop.f32.mrf.mxu0  ;;  %v3323_v18 = vld [vmem:[%s5055_s3 + $0x214] sm:$0xf0]  ;;  %1867 = vmatpush.bf16.msra.mxu2 %v2745_v23  ;;  %v3104_v23 = vld [vmem:[%s5055_s3 + $0x3d0] sm:$0xf] }
  0xa2   :  { %v836_v0 = vadd.f32 %v835_v45, %v160_v40  ;;  %1879 = vmatpush.bf16.msra.mxu3 %v2825_v14  ;;  %v2881_v30 = vor.u32 %v3323_v18, %v2880_v15  ;;  %v2945_v45 = vor.u32 %v3339_v44, %v2944_v43  ;;  %v2730_v14 = vld [vmem:[%s5055_s3 + $0xe8] sm:$0xf0]  ;;  %v3113_v15 = vor.u32 %v3381_v12, %v3112_v11  ;;  %v3361_v18 = vld [vmem:[%s5055_s3 + $0x344] sm:$0xf0]  ;;  %v3276_v11 = vld [vmem:[%s5055_s3 + $0xa4] sm:$0xf] }
  0xa3   :  { %1853 = vmatpush.bf16.msra.mxu1 %v2681_v22  ;;  %v849_v50 = vpop.f32.mrf.mxu1 }
  0xa4   :  { %v850_v16 = vadd.f32 %v849_v50, %v836_v0  ;;  %v2809_v50 = vor.u32 %v3305_v47, %v2808_v46  ;;  %v3383_v0 = vld [vmem:[%s5055_s3 + $0x3f4] sm:$0xf0]  ;;  %v3357_v46 = vld [vmem:[%s5055_s3 + $0x324] sm:$0xf0] }
  0xa5   :  { %1888 = vmatpush.bf16.msrb.mxu0 %v2929_v21  ;;  %v3121_v2 = vor.u32 %v3383_v0, %v3120_v62 }
  0xa7   :  { %1902 = vmatpush.bf16.msrb.mxu1 %v2993_v26  ;;  %v863_v1 = vpop.f32.mrf.mxu2 }
  0xa8   :  { %v864_v21 = vadd.f32 %v863_v1, %v161_v4  ;;  %v3286_v1 = vld [vmem:[%s5055_s3 + $0xf4] sm:$0xf] }
  0xa9   :  { %1889 = vmatpush.bf16.msrb.mxu0 %v2921_v29  ;;  %v877_v5 = vpop.f32.mrf.mxu3  ;;  %v837_v13 = vpop.f32.mrf.mxu0  ;;  %v3307_v29 = vld [vmem:[%s5055_s3 + $0x194] sm:$0xf0]  ;;  %v2741_v7 = vor.u32 %v3286_v1, %v2738_v3  ;;  %v3008_v1 = vld [vmem:[%s5055_s3 + $0x310] sm:$0xf] }
  0xaa   :  { %v838_v17 = vadd.f32 %v837_v13, %v160_v40  ;;  %v2817_v31 = vor.u32 %v3307_v29, %v2816_v28  ;;  %v878_v38 = vadd.f32 %v877_v5, %v864_v21  ;;  %v3363_v5 = vld [vmem:[%s5055_s3 + $0x354] sm:$0xf0]  ;;  %v3284_v13 = vld [vmem:[%s5055_s3 + $0xe4] sm:$0xf]  ;;  %v2722_v28 = vld [vmem:[%s5055_s3 + $0xd8] sm:$0xf0] }
  0xab   :  { %1903 = vmatpush.bf16.msrb.mxu1 %v2985_v56  ;;  %v851_v22 = vpop.f32.mrf.mxu1  ;;  %v2872_v56 = vld [vmem:[%s5055_s3 + $0x200] sm:$0xf]  ;;  %v3264_v21 = vld [vmem:[%s5055_s3 + $0x44] sm:$0xf] }
  0xac   :  { %v852_v26 = vadd.f32 %v851_v22, %v838_v17  ;;  %1880 = vmatpush.bf16.msra.mxu3 %v2817_v31  ;;  %v3032_v17 = vld [vmem:[%s5055_s3 + $0x340] sm:$0xf]  ;;  %v2650_v22 = vld [vmem:[%s5055_s3 + $0x48] sm:$0xf0]  ;;  %v2725_v31 = vor.u32 %v3282_v25, %v2722_v28  ;;  %v2802_v25 = vld [vmem:[%s5055_s3 + $0x178] sm:$0xf0] }
  0xad   :  { %1890 = vmatpush.bf16.msrb.mxu0 %v2913_v32  ;;  %v3321_v32 = vld [vmem:[%s5055_s3 + $0x204] sm:$0xf0]  ;;  %v3033_v20 = vor.u32 %v3361_v18, %v3032_v17  ;;  %v3000_v18 = vld [vmem:[%s5055_s3 + $0x300] sm:$0xf] }
  0xae   :  { %v4506_v63 = vpack.c.bf16 %v852_v26, %v850_v16  ;;  %v2873_v49 = vor.u32 %v3321_v32, %v2872_v56  ;;  %v2733_v16 = vor.u32 %v3284_v13, %v2730_v14  ;;  %v162_v26 = vperm.slane %v4400_v33, 2  ;;  %v3024_v56 = vld [vmem:[%s5055_s3 + $0x330] sm:$0xf]  ;;  %v3359_v32 = vld [vmem:[%s5055_s3 + $0x334] sm:$0xf0] }
  0xaf   :  { %1904 = vmatpush.bf16.msrb.mxu1 %v2977_v42  ;;  %v865_v34 = vpop.f32.mrf.mxu2  ;;  %v2674_v42 = vld [vmem:[%s5055_s3 + $0x78] sm:$0xf0] }
  0xb0   :  { %v866_v39 = vadd.f32 %v865_v34, %v161_v4  ;;  %1840 = vmatmul.bf16.vlgmr.msra.gmra.mxu0 %v4506_v63  ;;  %v2677_v51 = vor.u32 %v3270_v37, %v2674_v42  ;;  %1881 = vmatpush.bf16.msra.mxu3 %v2809_v50  ;;  %v3040_v4 = vld [vmem:[%s5055_s3 + $0x350] sm:$0xf]  ;;  %v3262_v34 = vld [vmem:[%s5055_s3 + $0x34] sm:$0xf]  ;;  %v2642_v37 = vld [vmem:[%s5055_s3 + $0x38] sm:$0xf0] }
  0xb1   :  { %1891 = vmatpush.bf16.msrb.mxu0 %v2905_v41  ;;  %v879_v40 = vpop.f32.mrf.mxu3  ;;  %v3057_v41 = vor.u32 %v3367_v36, %v3056_v35  ;;  %v3041_v8 = vor.u32 %v3363_v5, %v3040_v4  ;;  %v3025_v36 = vor.u32 %v3359_v32, %v3024_v56  ;;  %v2714_v42 = vld [vmem:[%s5055_s3 + $0xc8] sm:$0xf0]  ;;  %v2645_v44 = vor.u32 %v3262_v34, %v2642_v37  ;;  %v3274_v56 = vld [vmem:[%s5055_s3 + $0x94] sm:$0xf]  ;;  %v2690_v32 = vld [vmem:[%s5055_s3 + $0x98] sm:$0xf0] }
  0xb2   :  { %v880_v48 = vadd.f32 %v879_v40, %v866_v39  ;;  %v3377_v39 = vld [vmem:[%s5055_s3 + $0x3c4] sm:$0xf0]  ;;  %v2634_v50 = vld [vmem:[%s5055_s3 + $0x28] sm:$0xf0]  ;;  %v2693_v37 = vor.u32 %v3274_v56, %v2690_v32  ;;  %v3308_v56 = vld [vmem:[%s5055_s3 + $0x1a4] sm:$0xf] }
  0xb3   :  { %1905 = vmatpush.bf16.msrb.mxu1 %v2969_v55  ;;  %1916 = vmatpush.bf16.msrb.mxu2 %v3057_v41  ;;  %v3280_v41 = vld [vmem:[%s5055_s3 + $0xc4] sm:$0xf]  ;;  %v2826_v32 = vld [vmem:[%s5055_s3 + $0x1a8] sm:$0xf0] }
  0xb4   :  { %v4542_v55 = vpack.c.bf16 %v880_v48, %v878_v38  ;;  %1930 = vmatpush.bf16.msrb.mxu3 %v3121_v2  ;;  %v3096_v38 = vld [vmem:[%s5055_s3 + $0x3c0] sm:$0xf]  ;;  %v2717_v43 = vor.u32 %v3280_v41, %v2714_v42  ;;  %v3355_v2 = vld [vmem:[%s5055_s3 + $0x314] sm:$0xf0] }
  0xb5   :  { %1892 = vmatpush.bf16.msrb.mxu0 %v2897_v57  ;;  %v3049_v57 = vor.u32 %v3365_v53, %v3048_v52  ;;  %v3097_v40 = vor.u32 %v3377_v39, %v3096_v38  ;;  %v3375_v52 = vld [vmem:[%s5055_s3 + $0x3b4] sm:$0xf0]  ;;  %v3278_v53 = vld [vmem:[%s5055_s3 + $0xb4] sm:$0xf]  ;;  %v3300_v38 = vld [vmem:[%s5055_s3 + $0x164] sm:$0xf] }
  0xb6   :  { %1854 = vmatmul.bf16.vlgmr.msra.gmra.mxu1 %v4542_v55  ;;  %v2709_v0 = vor.u32 %v3278_v53, %v2706_v59  ;;  %v2794_v39 = vld [vmem:[%s5055_s3 + $0x168] sm:$0xf0]  ;;  %v3064_v42 = vld [vmem:[%s5055_s3 + $0x380] sm:$0xf]  ;;  %v2786_v53 = vld [vmem:[%s5055_s3 + $0x158] sm:$0xf0] }
  0xb7   :  { %1906 = vmatpush.bf16.msrb.mxu1 %v2961_v10  ;;  %1917 = vmatpush.bf16.msrb.mxu2 %v3049_v57  ;;  %v2658_v10 = vld [vmem:[%s5055_s3 + $0x58] sm:$0xf0]  ;;  %v2797_v41 = vor.u32 %v3300_v38, %v2794_v39 }
  0xb8   :  { %1931 = vmatpush.bf16.msrb.mxu3 %v3113_v15  ;;  %v2698_v15 = vld [vmem:[%s5055_s3 + $0xa8] sm:$0xf0] }
  0xb9   :  { %1893 = vmatpush.bf16.msrb.mxu0 %v2889_v9  ;;  %v3266_v9 = vld [vmem:[%s5055_s3 + $0x54] sm:$0xf]  ;;  %v2701_v17 = vor.u32 %v3276_v11, %v2698_v15 }
  0xba   :  { %v2661_v19 = vor.u32 %v3266_v9, %v2658_v10  ;;  %v3080_v9 = vld [vmem:[%s5055_s3 + $0x3a0] sm:$0xf]  ;;  %v3373_v10 = vld [vmem:[%s5055_s3 + $0x3a4] sm:$0xf0] }
  0xbb   :  { %1907 = vmatpush.bf16.msrb.mxu1 %v2953_v27  ;;  %1918 = vmatpush.bf16.msrb.mxu2 %v3041_v8  ;;  %v3105_v27 = vor.u32 %v3379_v24, %v3104_v23  ;;  %v2626_v8 = vld [vmem:[%s5055_s3 + $0x18] sm:$0xf0]  ;;  %v3081_v14 = vor.u32 %v3373_v10, %v3080_v9  ;;  %v2618_v23 = vld [vmem:[%s5055_s3 + $0x8] sm:$0xf0]  ;;  %v3302_v24 = vld [vmem:[%s5055_s3 + $0x174] sm:$0xf] }
  0xbc   :  { %v164_v9 = vperm.slane %v4400_v33, 4 }
  0xbd   :  { %1894 = vmatpush.bf16.msrb.mxu0 %v2881_v30  ;;  %v2653_v30 = vor.u32 %v3264_v21, %v2650_v22  ;;  %1932 = vmatpush.bf16.msrb.mxu3 %v3105_v27  ;;  %v3072_v27 = vld [vmem:[%s5055_s3 + $0x390] sm:$0xf] }
  0xbf   :  { %1908 = vmatpush.bf16.msrb.mxu1 %v2945_v45  ;;  %1919 = vmatpush.bf16.msrb.mxu2 %v3033_v20  ;;  %v3016_v45 = vld [vmem:[%s5055_s3 + $0x320] sm:$0xf]  ;;  %v3256_v20 = vld [vmem:[%s5055_s3 + $0x4] sm:$0xf] }
  0xc0   :  { %v3017_v48 = vor.u32 %v3357_v46, %v3016_v45  ;;  %v3272_v45 = vld [vmem:[%s5055_s3 + $0x84] sm:$0xf]  ;;  %v2682_v46 = vld [vmem:[%s5055_s3 + $0x88] sm:$0xf0] }
  0xc1   :  { %1895 = vmatpush.bf16.msrb.mxu0 %v2873_v49  ;;  %v891_v29 = vpop.f32.mrf.mxu0  ;;  %1933 = vmatpush.bf16.msrb.mxu3 %v3097_v40  ;;  %v3260_v49 = vld [vmem:[%s5055_s3 + $0x24] sm:$0xf] }
  0xc2   :  { %v892_v47 = vadd.f32 %v891_v29, %v162_v26  ;;  %v2637_v62 = vor.u32 %v3260_v49, %v2634_v50  ;;  %v2685_v49 = vor.u32 %v3272_v45, %v2682_v46  ;;  %v2866_v50 = vld [vmem:[%s5055_s3 + $0x1f8] sm:$0xf0] }
  0xc3   :  { %1909 = vmatpush.bf16.msrb.mxu1 %v2937_v61  ;;  %v905_v35 = vpop.f32.mrf.mxu1  ;;  %1920 = vmatpush.bf16.msrb.mxu2 %v3025_v36  ;;  %v2818_v45 = vld [vmem:[%s5055_s3 + $0x198] sm:$0xf0] }
  0xc4   :  { %v906_v3 = vadd.f32 %v905_v35, %v892_v47  ;;  %v3318_v47 = vld [vmem:[%s5055_s3 + $0x1f4] sm:$0xf] }
  0xc5   :  { %1944 = vmatpush.bf16.msra.mxu0 %v2677_v51  ;;  %v3088_v51 = vld [vmem:[%s5055_s3 + $0x3b0] sm:$0xf] }
  0xc6   :  { %v3089_v58 = vor.u32 %v3375_v52, %v3088_v51  ;;  %v2869_v51 = vor.u32 %v3318_v47, %v2866_v50  ;;  %v3298_v52 = vld [vmem:[%s5055_s3 + $0x154] sm:$0xf] }
  0xc7   :  { %1958 = vmatpush.bf16.msra.mxu1 %v2741_v7  ;;  %v919_v57 = vpop.f32.mrf.mxu2  ;;  %1921 = vmatpush.bf16.msrb.mxu2 %v3017_v48  ;;  %v3258_v7 = vld [vmem:[%s5055_s3 + $0x14] sm:$0xf] }
  0xc8   :  { %1934 = vmatpush.bf16.msrb.mxu3 %v3089_v58  ;;  %v920_v12 = vadd.f32 %v919_v57, %v163_v54  ;;  %v3316_v57 = vld [vmem:[%s5055_s3 + $0x1e4] sm:$0xf]  ;;  %v2858_v58 = vld [vmem:[%s5055_s3 + $0x1e8] sm:$0xf0] }
  0xc9   :  { %1945 = vmatpush.bf16.msra.mxu0 %v2669_v6  ;;  %v893_v60 = vpop.f32.mrf.mxu0  ;;  %v933_v61 = vpop.f32.mrf.mxu3  ;;  %v3009_v6 = vor.u32 %v3355_v2, %v3008_v1  ;;  %v2861_v59 = vor.u32 %v3316_v57, %v2858_v58  ;;  %v2850_v1 = vld [vmem:[%s5055_s3 + $0x1d8] sm:$0xf0]  ;;  %v3330_v57 = vld [vmem:[%s5055_s3 + $0x254] sm:$0xf] }
  0xca   :  { %v894_v4 = vadd.f32 %v893_v60, %v162_v26  ;;  %v2805_v26 = vor.u32 %v3302_v24, %v2802_v25  ;;  %v934_v28 = vadd.f32 %v933_v61, %v920_v12  ;;  %v3296_v60 = vld [vmem:[%s5055_s3 + $0x144] sm:$0xf]  ;;  %v2778_v61 = vld [vmem:[%s5055_s3 + $0x148] sm:$0xf0]  ;;  %v2914_v58 = vld [vmem:[%s5055_s3 + $0x258] sm:$0xf0] }
  0xcb   :  { %1959 = vmatpush.bf16.msra.mxu1 %v2733_v16  ;;  %v907_v5 = vpop.f32.mrf.mxu1  ;;  %1922 = vmatpush.bf16.msrb.mxu2 %v3009_v6  ;;  %v2629_v16 = vor.u32 %v3258_v7, %v2626_v8  ;;  %v3312_v7 = vld [vmem:[%s5055_s3 + $0x1c4] sm:$0xf]  ;;  %v2842_v8 = vld [vmem:[%s5055_s3 + $0x1c8] sm:$0xf0] }
  0xcc   :  { %v908_v13 = vadd.f32 %v907_v5, %v894_v4  ;;  %1935 = vmatpush.bf16.msrb.mxu3 %v3081_v14  ;;  %v2770_v4 = vld [vmem:[%s5055_s3 + $0x138] sm:$0xf0]  ;;  %v2845_v11 = vor.u32 %v3312_v7, %v2842_v8  ;;  %v3292_v12 = vld [vmem:[%s5055_s3 + $0x124] sm:$0xf] }
  0xcd   :  { %1946 = vmatpush.bf16.msra.mxu0 %v2661_v19  ;;  %v3353_v19 = vld [vmem:[%s5055_s3 + $0x304] sm:$0xf0] }
  0xce   :  { %v4697_v21 = vpack.c.bf16 %v908_v13, %v906_v3  ;;  %v3001_v22 = vor.u32 %v3353_v19, %v3000_v18  ;;  %v3294_v3 = vld [vmem:[%s5055_s3 + $0x134] sm:$0xf]  ;;  %v2762_v13 = vld [vmem:[%s5055_s3 + $0x128] sm:$0xf0] }
  0xcf   :  { %1960 = vmatpush.bf16.msra.mxu1 %v2725_v31  ;;  %v921_v29 = vpop.f32.mrf.mxu2  ;;  %v3371_v31 = vld [vmem:[%s5055_s3 + $0x394] sm:$0xf0]  ;;  %v2773_v6 = vor.u32 %v3294_v3, %v2770_v4  ;;  %v2765_v14 = vor.u32 %v3292_v12, %v2762_v13  ;;  %v3348_v3 = vld [vmem:[%s5055_s3 + $0x2e4] sm:$0xf]  ;;  %v2986_v4 = vld [vmem:[%s5055_s3 + $0x2e8] sm:$0xf0] }
  0xd0   :  { %1868 = vmatmul.bf16.vlgmr.msra.gmra.mxu2 %v4697_v21  ;;  %v922_v34 = vadd.f32 %v921_v29, %v163_v54  ;;  %v3073_v36 = vor.u32 %v3371_v31, %v3072_v27  ;;  %v2789_v54 = vor.u32 %v3298_v52, %v2786_v53  ;;  %v2930_v31 = vld [vmem:[%s5055_s3 + $0x278] sm:$0xf0]  ;;  %v3350_v53 = vld [vmem:[%s5055_s3 + $0x2f4] sm:$0xf]  ;;  %v2989_v7 = vor.u32 %v3348_v3, %v2986_v4 }
  0xd1   :  { %1947 = vmatpush.bf16.msra.mxu0 %v2653_v30  ;;  %v2621_v30 = vor.u32 %v3256_v20, %v2618_v23  ;;  %v935_v35 = vpop.f32.mrf.mxu3  ;;  %1923 = vmatpush.bf16.msrb.mxu2 %v3001_v22  ;;  %v3290_v20 = vld [vmem:[%s5055_s3 + $0x114] sm:$0xf]  ;;  %v2754_v22 = vld [vmem:[%s5055_s3 + $0x118] sm:$0xf0]  ;;  %v165_v23 = vperm.slane %v4400_v33, 5 }
  0xd2   :  { %v936_v40 = vadd.f32 %v935_v35, %v922_v34  ;;  %1936 = vmatpush.bf16.msrb.mxu3 %v3073_v36  ;;  %v2757_v27 = vor.u32 %v3290_v20, %v2754_v22  ;;  %v2829_v34 = vor.u32 %v3308_v56, %v2826_v32  ;;  %v3288_v36 = vld [vmem:[%s5055_s3 + $0x104] sm:$0xf]  ;;  %v2898_v12 = vld [vmem:[%s5055_s3 + $0x238] sm:$0xf0]  ;;  %v2954_v32 = vld [vmem:[%s5055_s3 + $0x2a8] sm:$0xf0] }
  0xd3   :  { %1961 = vmatpush.bf16.msra.mxu1 %v2717_v43  ;;  %v3369_v43 = vld [vmem:[%s5055_s3 + $0x384] sm:$0xf0]  ;;  %v3340_v56 = vld [vmem:[%s5055_s3 + $0x2a4] sm:$0xf]  ;;  %v3362_v3 = vld [vmem:[%s5055_s3 + $0x354] sm:$0xf] }
  0xd4   :  { %v4742_v48 = vpack.c.bf16 %v936_v40, %v934_v28  ;;  %v3332_v40 = vld [vmem:[%s5055_s3 + $0x264] sm:$0xf]  ;;  %v3042_v4 = vld [vmem:[%s5055_s3 + $0x358] sm:$0xf0] }
  0xd5   :  { %1948 = vmatpush.bf16.msra.mxu0 %v2645_v44  ;;  %1972 = vmatpush.bf16.msra.mxu2 %v2805_v26  ;;  %v3065_v44 = vor.u32 %v3369_v43, %v3064_v42  ;;  %v3334_v26 = vld [vmem:[%s5055_s3 + $0x274] sm:$0xf]  ;;  %v2922_v43 = vld [vmem:[%s5055_s3 + $0x268] sm:$0xf0] }
  0xd6   :  { %1882 = vmatmul.bf16.vlgmr.msra.gmra.mxu3 %v4742_v48  ;;  %v2933_v39 = vor.u32 %v3334_v26, %v2930_v31  ;;  %v2925_v52 = vor.u32 %v3332_v40, %v2922_v43  ;;  %v2962_v26 = vld [vmem:[%s5055_s3 + $0x2b8] sm:$0xf0] }
  0xd7   :  { %1962 = vmatpush.bf16.msra.mxu1 %v2709_v0  ;;  %1937 = vmatpush.bf16.msrb.mxu3 %v3065_v44  ;;  %v3314_v0 = vld [vmem:[%s5055_s3 + $0x1d4] sm:$0xf]  ;;  %v3058_v40 = vld [vmem:[%s5055_s3 + $0x378] sm:$0xf0] }
  0xd8   :  { %v2853_v2 = vor.u32 %v3314_v0, %v2850_v1  ;;  %v3306_v44 = vld [vmem:[%s5055_s3 + $0x194] sm:$0xf] }
  0xd9   :  { %1949 = vmatpush.bf16.msra.mxu0 %v2637_v62  ;;  %1973 = vmatpush.bf16.msra.mxu2 %v2797_v41  ;;  %v2781_v62 = vor.u32 %v3296_v60, %v2778_v61  ;;  %v2821_v46 = vor.u32 %v3306_v44, %v2818_v45  ;;  %v2810_v60 = vld [vmem:[%s5055_s3 + $0x188] sm:$0xf0]  ;;  %v2957_v44 = vor.u32 %v3340_v56, %v2954_v32  ;;  %v3372_v56 = vld [vmem:[%s5055_s3 + $0x3a4] sm:$0xf] }
  0xda   :  { %v3082_v32 = vld [vmem:[%s5055_s3 + $0x3a8] sm:$0xf0] }
  0xdb   :  { %1963 = vmatpush.bf16.msra.mxu1 %v2701_v17  ;;  %1986 = vmatpush.bf16.msra.mxu3 %v2869_v51  ;;  %v2834_v17 = vld [vmem:[%s5055_s3 + $0x1b8] sm:$0xf0] }
  0xdd   :  { %1950 = vmatpush.bf16.msra.mxu0 %v2629_v16  ;;  %1974 = vmatpush.bf16.msra.mxu2 %v2789_v54  ;;  %v3310_v16 = vld [vmem:[%s5055_s3 + $0x1b4] sm:$0xf]  ;;  %v2994_v54 = vld [vmem:[%s5055_s3 + $0x2f8] sm:$0xf0] }
  0xde   :  { %v2837_v18 = vor.u32 %v3310_v16, %v2834_v17  ;;  %v2997_v0 = vor.u32 %v3350_v53, %v2994_v54  ;;  %v2970_v16 = vld [vmem:[%s5055_s3 + $0x2c8] sm:$0xf0] }
  0xdf   :  { %1964 = vmatpush.bf16.msra.mxu1 %v2693_v37  ;;  %1987 = vmatpush.bf16.msra.mxu3 %v2861_v59  ;;  %v2746_v37 = vld [vmem:[%s5055_s3 + $0x108] sm:$0xf0]  ;;  %v3304_v59 = vld [vmem:[%s5055_s3 + $0x184] sm:$0xf] }
  0xe0   :  { %v2749_v41 = vor.u32 %v3288_v36, %v2746_v37  ;;  %v3320_v36 = vld [vmem:[%s5055_s3 + $0x204] sm:$0xf]  ;;  %v2874_v37 = vld [vmem:[%s5055_s3 + $0x208] sm:$0xf0] }
  0xe1   :  { %1951 = vmatpush.bf16.msra.mxu0 %v2621_v30  ;;  %1975 = vmatpush.bf16.msra.mxu2 %v2781_v62  ;;  %v947_v5 = vpop.f32.mrf.mxu0  ;;  %v2813_v62 = vor.u32 %v3304_v59, %v2810_v60  ;;  %v2938_v59 = vld [vmem:[%s5055_s3 + $0x288] sm:$0xf0] }
  0xe2   :  { %v948_v15 = vadd.f32 %v947_v5, %v164_v9  ;;  %v3328_v5 = vld [vmem:[%s5055_s3 + $0x244] sm:$0xf] }
  0xe3   :  { %1965 = vmatpush.bf16.msra.mxu1 %v2685_v49  ;;  %v961_v10 = vpop.f32.mrf.mxu1  ;;  %1988 = vmatpush.bf16.msra.mxu3 %v2853_v2  ;;  %v2917_v2 = vor.u32 %v3330_v57, %v2914_v58  ;;  %v3336_v58 = vld [vmem:[%s5055_s3 + $0x284] sm:$0xf] }
  0xe4   :  { %v962_v28 = vadd.f32 %v961_v10, %v948_v15  ;;  %v2978_v10 = vld [vmem:[%s5055_s3 + $0x2d8] sm:$0xf0]  ;;  %v3344_v15 = vld [vmem:[%s5055_s3 + $0x2c4] sm:$0xf] }
  0xe5   :  { %1976 = vmatpush.bf16.msra.mxu2 %v2773_v6  ;;  %v2906_v6 = vld [vmem:[%s5055_s3 + $0x248] sm:$0xf0]  ;;  %v2973_v22 = vor.u32 %v3344_v15, %v2970_v16  ;;  %v3378_v16 = vld [vmem:[%s5055_s3 + $0x3d4] sm:$0xf] }
  0xe6   :  { %v2909_v8 = vor.u32 %v3328_v5, %v2906_v6 }
  0xe7   :  { %1989 = vmatpush.bf16.msra.mxu3 %v2845_v11  ;;  %v975_v19 = vpop.f32.mrf.mxu2  ;;  %v3326_v11 = vld [vmem:[%s5055_s3 + $0x234] sm:$0xf] }
  0xe8   :  { %v976_v38 = vadd.f32 %v975_v19, %v165_v23  ;;  %v2890_v19 = vld [vmem:[%s5055_s3 + $0x228] sm:$0xf0] }
  0xe9   :  { %1977 = vmatpush.bf16.msra.mxu2 %v2765_v14  ;;  %v949_v24 = vpop.f32.mrf.mxu0  ;;  %v989_v25 = vpop.f32.mrf.mxu3  ;;  %v2901_v14 = vor.u32 %v3326_v11, %v2898_v12  ;;  %v3380_v11 = vld [vmem:[%s5055_s3 + $0x3e4] sm:$0xf]  ;;  %v3114_v12 = vld [vmem:[%s5055_s3 + $0x3e8] sm:$0xf0] }
  0xea   :  { %v950_v29 = vadd.f32 %v949_v24, %v164_v9  ;;  %v990_v49 = vadd.f32 %v989_v25, %v976_v38  ;;  %v3346_v9 = vld [vmem:[%s5055_s3 + $0x2d4] sm:$0xf] }
  0xeb   :  { %v963_v30 = vpop.f32.mrf.mxu1  ;;  %1990 = vmatpush.bf16.msra.mxu3 %v2837_v18  ;;  %v2981_v13 = vor.u32 %v3346_v9, %v2978_v10  ;;  %v3324_v18 = vld [vmem:[%s5055_s3 + $0x224] sm:$0xf]  ;;  %v3342_v25 = vld [vmem:[%s5055_s3 + $0x2b4] sm:$0xf]  ;;  %v3045_v10 = vor.u32 %v3362_v3, %v3042_v4 }
  0xec   :  { %v964_v35 = vadd.f32 %v963_v30, %v950_v29  ;;  %v2893_v24 = vor.u32 %v3324_v18, %v2890_v19  ;;  %v3358_v18 = vld [vmem:[%s5055_s3 + $0x334] sm:$0xf]  ;;  %v3026_v19 = vld [vmem:[%s5055_s3 + $0x338] sm:$0xf0] }
  0xed   :  { %1978 = vmatpush.bf16.msra.mxu2 %v2757_v27  ;;  %v3322_v27 = vld [vmem:[%s5055_s3 + $0x214] sm:$0xf] }
  0xee   :  { %v4825_v42 = vpack.c.bf16 %v964_v35, %v962_v28  ;;  %v2965_v28 = vor.u32 %v3342_v25, %v2962_v26  ;;  %v3018_v25 = vld [vmem:[%s5055_s3 + $0x328] sm:$0xf0] }
  0xef   :  { %1991 = vmatpush.bf16.msra.mxu3 %v2829_v34  ;;  %v977_v47 = vpop.f32.mrf.mxu2 }
  0xf0   :  { %1896 = vmatmul.bf16.vlgmr.msrb.gmra.mxu0 %v4825_v42  ;;  %v978_v50 = vadd.f32 %v977_v47, %v165_v23  ;;  %v166_v23 = vperm.slane %v4400_v33, 6  ;;  %v2877_v47 = vor.u32 %v3320_v36, %v2874_v37  ;;  %v3085_v36 = vor.u32 %v3372_v56, %v3082_v32 }
  0xf1   :  { %1979 = vmatpush.bf16.msra.mxu2 %v2749_v41  ;;  %v991_v51 = vpop.f32.mrf.mxu3  ;;  %2000 = vmatpush.bf16.msrb.mxu0 %v2933_v39  ;;  %v3366_v39 = vld [vmem:[%s5055_s3 + $0x374] sm:$0xf]  ;;  %v167_v41 = vperm.slane %v4400_v33, 7  ;;  %v3364_v33 = vld [vmem:[%s5055_s3 + $0x364] sm:$0xf] }
  0xf2   :  { %v992_v61 = vadd.f32 %v991_v51, %v978_v50  ;;  %v3061_v50 = vor.u32 %v3366_v39, %v3058_v40  ;;  %v3074_v39 = vld [vmem:[%s5055_s3 + $0x398] sm:$0xf0] }
  0xf3   :  { %1992 = vmatpush.bf16.msra.mxu3 %v2821_v46 }
  0xf4   :  { %v4855_v1 = vpack.c.bf16 %v992_v61, %v990_v49  ;;  %v2946_v49 = vld [vmem:[%s5055_s3 + $0x298] sm:$0xf0] }
  0xf5   :  { %2001 = vmatpush.bf16.msrb.mxu0 %v2925_v52  ;;  %v3050_v52 = vld [vmem:[%s5055_s3 + $0x368] sm:$0xf0] }
  0xf6   :  { %1910 = vmatmul.bf16.vlgmr.msrb.gmra.mxu1 %v4855_v1  ;;  %v3053_v61 = vor.u32 %v3364_v33, %v3050_v52 }
  0xf7   :  { %1993 = vmatpush.bf16.msra.mxu3 %v2813_v62  ;;  %2014 = vmatpush.bf16.msrb.mxu1 %v2997_v0  ;;  %v3382_v62 = vld [vmem:[%s5055_s3 + $0x3f4] sm:$0xf]  ;;  %v3122_v0 = vld [vmem:[%s5055_s3 + $0x3f8] sm:$0xf0] }
  0xf9   :  { %2002 = vmatpush.bf16.msrb.mxu0 %v2917_v2 }
  0xfb   :  { %2015 = vmatpush.bf16.msrb.mxu1 %v2989_v7  ;;  %v2941_v7 = vor.u32 %v3336_v58, %v2938_v59 }
  0xfd   :  { %2003 = vmatpush.bf16.msrb.mxu0 %v2909_v8  ;;  %v3125_v8 = vor.u32 %v3382_v62, %v3122_v0  ;;  %v1186_v62 = vld [vmem:[%s5057_s4] sm:$0x3] }
  0xfe   :  { %v1188_v3 = vperm.slane %v1186_v62, 0  ;;  %v1189_v4 = vperm.slane %v1186_v62, 1 }
  0xff   :  { %2016 = vmatpush.bf16.msrb.mxu1 %v2981_v13  ;;  %v3360_v13 = vld [vmem:[%s5055_s3 + $0x344] sm:$0xf] }
 0x100   :  { %1952 = vmatmul.bf16.vlgmr.msra.gmra.mxu0 %v4506_v63  ;;  %v2882_v63 = vld [vmem:[%s5055_s3 + $0x218] sm:$0xf0] }
 0x101   :  { %v1003_v17 = vpop.f32.mrf.mxu0  ;;  %2004 = vmatpush.bf16.msrb.mxu0 %v2901_v14  ;;  %v2885_v31 = vor.u32 %v3322_v27, %v2882_v63  ;;  %v3117_v14 = vor.u32 %v3380_v11, %v3114_v12  ;;  %v3374_v63 = vld [vmem:[%s5055_s3 + $0x3b4] sm:$0xf] }
 0x102   :  { %v1004_v29 = vadd.f32 %v1003_v17, %v166_v23  ;;  %v3106_v17 = vld [vmem:[%s5055_s3 + $0x3d8] sm:$0xf0] }
 0x103   :  { %v1017_v20 = vpop.f32.mrf.mxu1  ;;  %2017 = vmatpush.bf16.msrb.mxu1 %v2973_v22  ;;  %v3029_v22 = vor.u32 %v3358_v18, %v3026_v19 }
 0x104   :  { %v1018_v45 = vadd.f32 %v1017_v20, %v1004_v29  ;;  %v3109_v20 = vor.u32 %v3378_v16, %v3106_v17  ;;  %v3354_v29 = vld [vmem:[%s5055_s3 + $0x314] sm:$0xf] }
 0x105   :  { %2005 = vmatpush.bf16.msrb.mxu0 %v2893_v24  ;;  %v3356_v24 = vld [vmem:[%s5055_s3 + $0x324] sm:$0xf] }
 0x106   :  { %1966 = vmatmul.bf16.vlgmr.msra.gmra.mxu1 %v4542_v55  ;;  %v3338_v55 = vld [vmem:[%s5055_s3 + $0x294] sm:$0xf]  ;;  %v3021_v27 = vor.u32 %v3356_v24, %v3018_v25 }
 0x107   :  { %v1031_v30 = vpop.f32.mrf.mxu2  ;;  %2018 = vmatpush.bf16.msrb.mxu1 %v2965_v28  ;;  %v2949_v54 = vor.u32 %v3338_v55, %v2946_v49  ;;  %v3090_v28 = vld [vmem:[%s5055_s3 + $0x3b8] sm:$0xf0] }
 0x108   :  { %v1032_v53 = vadd.f32 %v1031_v30, %v167_v41  ;;  %v3010_v30 = vld [vmem:[%s5055_s3 + $0x318] sm:$0xf0] }
 0x109   :  { %v1045_v34 = vpop.f32.mrf.mxu3  ;;  %v1005_v35 = vpop.f32.mrf.mxu0  ;;  %2006 = vmatpush.bf16.msrb.mxu0 %v2885_v31  ;;  %v3013_v31 = vor.u32 %v3354_v29, %v3010_v30  ;;  %v2056_v29 = vld [vmem:[%s5059_s5] sm:$0x3] }
 0x10a   :  { %v1006_v38 = vadd.f32 %v1005_v35, %v166_v23  ;;  %v1046_v5 = vadd.f32 %v1045_v34, %v1032_v53  ;;  %v3376_v23 = vld [vmem:[%s5055_s3 + $0x3c4] sm:$0xf]  ;;  %v3002_v35 = vld [vmem:[%s5055_s3 + $0x308] sm:$0xf0] }
 0x10b   :  { %v1019_v43 = vpop.f32.mrf.mxu1  ;;  %2019 = vmatpush.bf16.msrb.mxu1 %v2957_v44  ;;  %v3352_v34 = vld [vmem:[%s5055_s3 + $0x304] sm:$0xf] }
 0x10c   :  { %v1020_v46 = vadd.f32 %v1019_v43, %v1006_v38  ;;  %v3005_v37 = vor.u32 %v3352_v34, %v3002_v35  ;;  %v3370_v38 = vld [vmem:[%s5055_s3 + $0x394] sm:$0xf]  ;;  %v2058_v34 = vperm.slane %v2056_v29, 0 }
 0x10d   :  { %2007 = vmatpush.bf16.msrb.mxu0 %v2877_v47  ;;  %v3077_v40 = vor.u32 %v3370_v38, %v3074_v39 }
 0x10e   :  { %v4934_v51 = vpack.c.bf16 %v1020_v46, %v1018_v45 }
 0x10f   :  { %v1033_v57 = vpop.f32.mrf.mxu2  ;;  %2020 = vmatpush.bf16.msrb.mxu1 %v2949_v54 }
 0x110   :  { %1924 = vmatmul.bf16.vlgmr.msrb.gmra.mxu2 %v4934_v51  ;;  %v1034_v60 = vadd.f32 %v1033_v57, %v167_v41  ;;  %2008 = vmatmul.bf16.vlgmr.msrb.gmra.mxu0 %v4825_v42  ;;  %v3034_v42 = vld [vmem:[%s5055_s3 + $0x348] sm:$0xf0]  ;;  %v3368_v41 = vld [vmem:[%s5055_s3 + $0x384] sm:$0xf] }
 0x111   :  { %2028 = vmatpush.bf16.msrb.mxu2 %v3061_v50  ;;  %v1047_v2 = vpop.f32.mrf.mxu3  ;;  %v3037_v15 = vor.u32 %v3360_v13, %v3034_v42 }
 0x112   :  { %v1048_v6 = vadd.f32 %v1047_v2, %v1034_v60 }
 0x113   :  { %2021 = vmatpush.bf16.msrb.mxu1 %v2941_v7 }
 0x114   :  { %v1057_v9 = vpack.c.bf16 %v1048_v6, %v1046_v5 }
 0x115   :  { %2029 = vmatpush.bf16.msrb.mxu2 %v3053_v61 }
 0x116   :  { %1938 = vmatmul.bf16.vlgmr.msrb.gmra.mxu3 %v1057_v9  ;;  %2022 = vmatmul.bf16.vlgmr.msrb.gmra.mxu1 %v4855_v1  ;;  %v3098_v1 = vld [vmem:[%s5055_s3 + $0x3c8] sm:$0xf0] }
 0x117   :  { %2042 = vmatpush.bf16.msrb.mxu3 %v3125_v8  ;;  %v3101_v26 = vor.u32 %v3376_v23, %v3098_v1  ;;  %v12_v8 = vstv %s5058_s6 }
 0x118   :  { %13 = vst [vmem:[#allocation2] sm:$0x1] %v12_v8 }
 0x119   :  { %2030 = vmatpush.bf16.msrb.mxu2 %v3045_v10 }
 0x11b   :  { %2043 = vmatpush.bf16.msrb.mxu3 %v3117_v14 }
 0x11d   :  { %2031 = vmatpush.bf16.msrb.mxu2 %v3037_v15 }
 0x11f   :  { %2044 = vmatpush.bf16.msrb.mxu3 %v3109_v20 }
 0x120   :  { %1980 = vmatmul.bf16.vlgmr.msra.gmra.mxu2 %v4697_v21  ;;  %v3093_v21 = vor.u32 %v3374_v63, %v3090_v28 }
 0x121   :  { %2032 = vmatpush.bf16.msrb.mxu2 %v3029_v22 }
 0x123   :  { %2045 = vmatpush.bf16.msrb.mxu3 %v3101_v26 }
 0x125   :  { %2033 = vmatpush.bf16.msrb.mxu2 %v3021_v27 }
 0x126   :  { %1994 = vmatmul.bf16.vlgmr.msra.gmra.mxu3 %v4742_v48  ;;  %v3066_v48 = vld [vmem:[%s5055_s3 + $0x388] sm:$0xf0] }
 0x127   :  { %2046 = vmatpush.bf16.msrb.mxu3 %v3093_v21  ;;  %v3069_v43 = vor.u32 %v3368_v41, %v3066_v48 }
 0x129   :  { %2034 = vmatpush.bf16.msrb.mxu2 %v3013_v31 }
 0x12b   :  { %2047 = vmatpush.bf16.msrb.mxu3 %v3085_v36  ;;  %v2059_v36 = vperm.slane %v2056_v29, 1 }
 0x12d   :  { %2035 = vmatpush.bf16.msrb.mxu2 %v3005_v37  ;;  %v1841_v44 = vpop.f32.mrf.mxu0 }
 0x12e   :  { %v1842_v6 = vadd.f32 %v1841_v44, %v1188_v3 }
 0x12f   :  { %2048 = vmatpush.bf16.msrb.mxu3 %v3077_v40 }
 0x130   :  { %2036 = vmatmul.bf16.vlgmr.msrb.gmra.mxu2 %v4934_v51 }
 0x133   :  { %2049 = vmatpush.bf16.msrb.mxu3 %v3069_v43  ;;  %v1855_v45 = vpop.f32.mrf.mxu1 }
 0x134   :  { %v1856_v13 = vadd.f32 %v1855_v45, %v1842_v6 }
 0x135   :  { %v1843_v46 = vpop.f32.mrf.mxu0 }
 0x136   :  { %2050 = vmatmul.bf16.vlgmr.msrb.gmra.mxu3 %v1057_v9  ;;  %v1844_v16 = vadd.f32 %v1843_v46, %v1188_v3 }
 0x13b   :  { %v1857_v55 = vpop.f32.mrf.mxu1 }
 0x13c   :  { %v1858_v24 = vadd.f32 %v1857_v55, %v1844_v16 }
 0x153   :  { %v1869_v47 = vpop.f32.mrf.mxu2 }
 0x154   :  { %v1870_v14 = vadd.f32 %v1869_v47, %v1856_v13 }
 0x159   :  { %v1883_v49 = vpop.f32.mrf.mxu3 }
 0x15a   :  { %v1884_v18 = vadd.f32 %v1883_v49, %v1870_v14 }
 0x15b   :  { %v1871_v33 = vpop.f32.mrf.mxu2 }
 0x15c   :  { %v1872_v28 = vadd.f32 %v1871_v33, %v1858_v24 }
 0x161   :  { %v1885_v53 = vpop.f32.mrf.mxu3 }
 0x162   :  { %v1886_v56 = vadd.f32 %v1885_v53, %v1872_v28 }
 0x16d   :  { %v1897_v50 = vpop.f32.mrf.mxu0 }
 0x16e   :  { %v1898_v22 = vadd.f32 %v1897_v50, %v1884_v18 }
 0x173   :  { %v1911_v52 = vpop.f32.mrf.mxu1 }
 0x174   :  { %v1912_v27 = vadd.f32 %v1911_v52, %v1898_v22 }
 0x175   :  { %v1899_v54 = vpop.f32.mrf.mxu0 }
 0x176   :  { %v1900_v39 = vadd.f32 %v1899_v54, %v1886_v56  ;;  %v3388_v54 = vmov 0  }
 0x177   :  { %3385 = vset.pattern.permute.xlu1 %v3388_v54  ;;  %3386 = vset.pattern.permute.xlu0 %v3388_v54 }
 0x17b   :  { %v1913_v58 = vpop.f32.mrf.mxu1 }
 0x17c   :  { %v1914_v48 = vadd.f32 %v1913_v58, %v1900_v39  ;;  %v3387_v58 = vld [vmem:[#allocation2] ss:$0 sm:$0xff] }
 0x17d   :  { %v1953_v61 = vpop.f32.mrf.mxu0 }
 0x17e   :  { %v1954_v7 = vadd.f32 %v1953_v61, %v1189_v4 }
 0x183   :  { %v1967_v51 = vpop.f32.mrf.mxu1 }
 0x184   :  { %v1968_v11 = vadd.f32 %v1967_v51, %v1954_v7 }
 0x185   :  { %v1955_v5 = vpop.f32.mrf.mxu0 }
 0x186   :  { %v1956_v19 = vadd.f32 %v1955_v5, %v1189_v4 }
 0x18b   :  { %v1969_v9 = vpop.f32.mrf.mxu1 }
 0x18c   :  { %v1970_v23 = vadd.f32 %v1969_v9, %v1956_v19 }
 0x18d   :  { %v2009_v17 = vpop.f32.mrf.mxu0 }
 0x193   :  { %v1925_v57 = vpop.f32.mrf.mxu2  ;;  %v2023_v25 = vpop.f32.mrf.mxu1 }
 0x194   :  { %v1926_v30 = vadd.f32 %v1925_v57, %v1912_v27 }
 0x195   :  { %v2011_v37 = vpop.f32.mrf.mxu0 }
 0x199   :  { %v1939_v59 = vpop.f32.mrf.mxu3 }
 0x19a   :  { %v1940_v32 = vadd.f32 %v1939_v59, %v1926_v30 }
 0x19b   :  { %v1927_v60 = vpop.f32.mrf.mxu2  ;;  %v2025_v45 = vpop.f32.mrf.mxu1 }
 0x19c   :  { %v2062_v43 = vmul.f32 %v2058_v34, %v1940_v32  ;;  %v1928_v47 = vadd.f32 %v1927_v60, %v1914_v48 }
 0x1a1   :  { %v1941_v0 = vpop.f32.mrf.mxu3 }
 0x1a2   :  { %v1942_v50 = vadd.f32 %v1941_v0, %v1928_v47 }
 0x1a3   :  { %v1981_v2 = vpop.f32.mrf.mxu2 }
 0x1a4   :  { %v1982_v42 = vadd.f32 %v1981_v2, %v1968_v11  ;;  %v2064_v57 = vmul.f32 %v2058_v34, %v1942_v50 }
 0x1a9   :  { %v1995_v10 = vpop.f32.mrf.mxu3 }
 0x1aa   :  { %v1996_v15 = vadd.f32 %v1995_v10, %v1982_v42 }
 0x1ab   :  { %v1983_v12 = vpop.f32.mrf.mxu2 }
 0x1ac   :  { %v2010_v1 = vadd.f32 %v2009_v17, %v1996_v15  ;;  %v1984_v63 = vadd.f32 %v1983_v12, %v1970_v23 }
 0x1ae   :  { %v2024_v31 = vadd.f32 %v2023_v25, %v2010_v1 }
 0x1b1   :  { %v1997_v20 = vpop.f32.mrf.mxu3 }
 0x1b2   :  { %v1998_v21 = vadd.f32 %v1997_v20, %v1984_v63 }
 0x1b3   :  { %v2037_v26 = vpop.f32.mrf.mxu2 }
 0x1b4   :  { %v2038_v35 = vadd.f32 %v2037_v26, %v2024_v31  ;;  %v2012_v40 = vadd.f32 %v2011_v37, %v1998_v21 }
 0x1b6   :  { %v2026_v55 = vadd.f32 %v2025_v45, %v2012_v40 }
 0x1b9   :  { %v2051_v38 = vpop.f32.mrf.mxu3 }
 0x1ba   :  { %v2052_v41 = vadd.f32 %v2051_v38, %v2038_v35 }
 0x1bb   :  { %v2039_v46 = vpop.f32.mrf.mxu2 }
 0x1bc   :  { %v2063_v44 = vmul.f32 %v2059_v36, %v2052_v41  ;;  %v2040_v33 = vadd.f32 %v2039_v46, %v2026_v55 }
 0x1be   :  { %v2066_v49 = vadd.f32 %v2063_v44, %v2062_v43 }
 0x1c0   :  { %2067 = vadd.xlane.f32.xlu0 %v2066_v49 }
 0x1c1   :  { %v2053_v52 = vpop.f32.mrf.mxu3 }
 0x1c2   :  { %v2054_v53 = vadd.f32 %v2053_v52, %v2040_v33 }
 0x1c4   :  { %v2065_v59 = vmul.f32 %v2059_v36, %v2054_v53 }
 0x1c6   :  { %v2069_v61 = vadd.f32 %v2065_v59, %v2064_v57 }
 0x1c8   :  { %2070 = vadd.xlane.f32.xlu0 %v2069_v61 }
 0x233   :  { %v2068_v51 = vpop.xlane.xlu0 %2067 }
 0x234   :  { %v2076_v62 = vadd.f32 %v3387_v58, %v2068_v51 }
 0x236   :  { %2080 = vperm.xlu1 %3385, %v2076_v62  }
 0x23b   :  { %v2071_v2 = vpop.xlane.xlu0 %2070 }
 0x23c   :  { %v2077_v60 = vadd.f32 %v3387_v58, %v2071_v2 }
 0x23e   :  { %2085 = vperm.xlu1 %3385, %v2077_v60  }
 0x2a8   :  { %v2081_v3 = vpop.permute.xlu1 %2080 }
 0x2a9   :  { %2088 = vst [vmem:[%s5060_s7] sm:$0xff] %v2081_v3 }
 0x2b0   :  { %v2086_v0 = vpop.permute.xlu1 %2085 }
 0x2b1   :  { %2089 = vst [vmem:[%s5060_s7 + $0x8] sm:$0xff] %v2086_v0 }

</bundles_post_ra>
